<compile_context>
chip_gen: v7x
topology: tpu7x:2x2x1
jax: 0.10.0
libtpu: 0.0.40
codegen_flags: <defaults>
</compile_context>

<pallas_src>
import jax
import jax.numpy as jnp
from jax.experimental import pallas as pl
from jax.experimental.pallas import tpu as pltpu

# ----------------------------- model dims (small, synthetic) -----------------------------
B = 2            # batch
S = 8            # sequence length
H = 32           # hidden dim
NUM_HEADS = 4
HEAD_DIM = H // NUM_HEADS
I = 64           # FFN intermediate dim
L = 2            # number of transformer layers
V = 100          # vocab size
LN_EPS = 1e-12   # BERT default
W3 = 3 * H       # fused QKV output width (= packed-bias-table lane width)
NBIAS_ROWS = 8   # rows of the per-layer packed bias/LN table
NHS = NUM_HEADS * S  # expanded (head-batched) key/value row count


# ----------------------------- shared math helpers -----------------------------
def _layer_norm_fused(x, gamma, beta):
    # One-pass statistics: Sx and Sx^2 computed independently (no serialized subtract
    # between the two cross-lane reductions); var = E[x^2] - E[x]^2.
    inv_n = jnp.float32(1.0 / x.shape[-1])
    mu = jnp.sum(x, axis=-1, keepdims=True) * inv_n
    ex2 = jnp.sum(x * x, axis=-1, keepdims=True) * inv_n
    var = jnp.maximum(ex2 - mu * mu, 0.0)
    return (x - mu) * jax.lax.rsqrt(var + LN_EPS) * gamma + beta


def _layer_norm_ref(x, gamma, beta):
    # Two-pass reference formulation (kept independent of the kernel's one-pass version).
    mu = jnp.mean(x, axis=-1, keepdims=True)
    var = jnp.mean((x - mu) ** 2, axis=-1, keepdims=True)
    return (x - mu) * jax.lax.rsqrt(var + LN_EPS) * gamma + beta


def _gelu(x):
    # TODO(synk): HF BERT/MiniLM uses exact (erf) GELU; tanh approximation kept for
    # robust Mosaic lowering (the in-file reference uses the same approximation).
    return jax.nn.gelu(x, approximate=True)


# ----------------------------- fused Pallas kernel -----------------------------
def fused_forward_kernel(x_ref, mask_ref, kbias_ref, emb_ln_ref,
                         wqkv_ref, wo_ref, w1_ref, w2_ref, bias_ref,
                         blk_ref, seg_ref, o_ref):
    """Embedding LN + L transformer layers + masked mean pooling, all in one kernel.

    x_ref     : (B, S, H)     summed (word+pos+type) embeddings, f32
    mask_ref  : (B, S)        attention mask, f32
    kbias_ref : (B, NH*S)     additive key mask (-1e9 on padded keys), tiled across heads
    emb_ln_ref: (2, H)        row 0 = gamma, row 1 = beta of embedding LayerNorm
    wqkv_ref  : (L, H, 3H)    fused QKV projection weights
    wo_ref    : (L, H, H)     attention output projection
    w1_ref    : (L, H, I)     FFN in
    w2_ref    : (L, I, H)     FFN out
    bias_ref  : (L, 8, 3H)    packed per-layer vectors:
                [b_qkv(3H), b_o(H), ln1_g(H), ln1_b(H), b_ffn1(I), b_ffn2(H), ln2_g(H), ln2_b(H)]
    blk_ref   : (NH*S, H)     block-diagonal head mask: 1 iff row's head == lane's head
    seg_ref   : (NH*S, NH*S)  per-head segment-sum matrix: 1 iff same head chunk
    o_ref     : (B, H)        pooled sentence embeddings
    """
    BS = B * S
    x2 = x_ref[...].reshape(BS, H)                        # (BS, H) -- 2-D throughout
    m = mask_ref[...]                                     # (B, S)

    # Hoisted broadcasts (outside the layer loop; broadcast_in_dim is not CSE'd by JAX).
    key_bias = jnp.broadcast_to(kbias_ref[...][:, None, :], (B, S, NHS))   # (B, S, NH*S)
    blk3 = jnp.broadcast_to(blk_ref[...][None, :, :], (B, NHS, H))         # (B, NH*S, H)
    seg = seg_ref[...]                                                     # (NH*S, NH*S)

    # Embedding layer-norm.
    x2 = _layer_norm_fused(x2, emb_ln_ref[0:1, :], emb_ln_ref[1:2, :])

    scale = jnp.float32(1.0 / (HEAD_DIM ** 0.5))

    # Static unroll over layers (L=2): all layers fused, weights sliced from stacked refs.
    for l in range(L):
        wqkv = wqkv_ref[l]                                # (H, 3H)
        wo = wo_ref[l]                                    # (H, H)
        w1 = w1_ref[l]                                    # (H, I)
        w2 = w2_ref[l]                                    # (I, H)
        bias = bias_ref[l]                                # (8, 3H)

        b_qkv = bias[0:1, :]                              # (1, 3H)
        b_o = bias[1:2, :H]                               # (1, H)
        g1, be1 = bias[2:3, :H], bias[3:4, :H]
        b_1 = bias[4:5, :I]                               # (1, I)
        b_2 = bias[5:6, :H]
        g2, be2 = bias[6:7, :H], bias[7:8, :H]

        # Fused QKV projection: one 2-D MXU matmul (BS,H) x (H,3H).
        qkv = jnp.dot(x2, wqkv, preferred_element_type=jnp.float32) + b_qkv

        q3 = qkv[:, 0 * H:1 * H].reshape(B, S, H)         # (B, S, H) -- all heads on lanes
        k3 = qkv[:, 1 * H:2 * H].reshape(B, S, H)
        v3 = qkv[:, 2 * H:3 * H].reshape(B, S, H)

        # Head-batched attention via block-diagonal expanded keys/values:
        # row m = h*S + k of k_rows/v_rows holds token k's features masked to head h's lanes.
        # Built with a leading-dim broadcast + (leading, sublane)->sublane merge only.
        k_rows = jnp.broadcast_to(k3[:, None], (B, NUM_HEADS, S, H)).reshape(B, NHS, H) * blk3
        v_rows = jnp.broadcast_to(v3[:, None], (B, NUM_HEADS, S, H)).reshape(B, NHS, H) * blk3

        # All-head scores in ONE batched einsum: s[b,q,h*S+k] = <q_h[b,q,:], k_h[b,k,:]>.
        s_all = jnp.einsum('bqh,bmh->bqm', q3, k_rows,
                           preferred_element_type=jnp.float32)             # (B, S, NH*S)

        # Softmax without max-subtraction (logits O(0.1); -1e9 mask -> exp underflows to 0).
        p = jnp.exp(s_all * scale + key_bias)                              # (B, S, NH*S)
        p2 = p.reshape(BS, NHS)
        den = jnp.dot(p2, seg, preferred_element_type=jnp.float32)         # per-head chunk sums
        p2 = p2 * pl.reciprocal(den, approx=True)                          # EUP vrcp

        # All-head context in ONE batched einsum; result is already the head-concatenated
        # (B, S, H) context (v_rows is block-diagonal in heads), so no concatenate needed.
        ctx = jnp.einsum('bqm,bmh->bqh', p2.reshape(B, S, NHS), v_rows,
                         preferred_element_type=jnp.float32)               # (B, S, H)

        # Attention output projection + residual + LN.
        attn_out = jnp.dot(ctx.reshape(BS, H), wo, preferred_element_type=jnp.float32) + b_o
        x2 = _layer_norm_fused(x2 + attn_out, g1, be1)

        # FFN + residual + LN.
        hdn = _gelu(jnp.dot(x2, w1, preferred_element_type=jnp.float32) + b_1)
        ffn = jnp.dot(hdn, w2, preferred_element_type=jnp.float32) + b_2
        x2 = _layer_norm_fused(x2 + ffn, g2, be2)

    # Masked mean pooling (== MeanPooling.forward).
    x3 = x2.reshape(B, S, H)
    summed = jnp.sum(x3 * m[:, :, None], axis=1)                       # (B, H)
    denom = jnp.maximum(jnp.sum(m, axis=1, keepdims=True), 1e-9)       # (B, 1)
    o_ref[...] = summed * pl.reciprocal(denom, approx=True)


# ----------------------------- wrapper -----------------------------
def _embed(params, input_ids):
    # Embedding gather stays in plain JAX (glue); everything else is one Pallas kernel.
    return (params['word_emb'][input_ids]
            + params['pos_emb'][None, :, :]
            + params['type_emb'][0][None, None, :]).astype(jnp.float32)


def _head_block_masks():
    row_head = jnp.arange(NHS) // S                        # head index of expanded row m
    lane_head = jnp.arange(H) // HEAD_DIM                  # head index of hidden lane j
    blk = (row_head[:, None] == lane_head[None, :]).astype(jnp.float32)   # (NH*S, H)
    seg = (row_head[:, None] == row_head[None, :]).astype(jnp.float32)    # (NH*S, NH*S)
    return blk, seg


def pallas_sentence_transformer_forward(params, input_ids, attention_mask):
    mask_f = attention_mask.astype(jnp.float32)                        # (B, S)
    x_emb = _embed(params, input_ids)                                  # (B, S, H)

    # Additive key mask tiled across heads along lanes: lane m = h*S + k  ->  key k.
    key_bias = jnp.tile((1.0 - mask_f) * jnp.float32(-1e9), (1, NUM_HEADS))   # (B, NH*S)
    blk, seg = _head_block_masks()

    # TODO(synk): at real MiniLM sizes (H=384, S=512, L=6+, large B):
    #   * add a grid with a leading L axis marked "arbitrary" streaming the stacked weights
    #     (index_map lambda l: (l, 0, 0), default Buffered(2)) so f32/bf16 weights are not
    #     fully resident -- required to fit v7x's 64 MiB physical VMEM;
    #   * mark batch/seq-tile axes "parallel" in dimension_semantics (2 TCs on v7x);
    #   * cast MXU operands to bf16 with preferred_element_type=f32 (keep LN/softmax/residual
    #     math in f32, especially on v5e which has no bf16 VPU/EUP);
    #   * size row/N tiles to 256-multiples on v6e/v7x (128 on v5e), keep outputs lane-dense.
    return pl.pallas_call(
        fused_forward_kernel,
        out_shape=jax.ShapeDtypeStruct((B, H), jnp.float32),
        in_specs=[pl.BlockSpec(memory_space=pltpu.MemorySpace.VMEM)] * 11,
        out_specs=pl.BlockSpec(memory_space=pltpu.MemorySpace.VMEM),
        compiler_params=pltpu.CompilerParams(vmem_limit_bytes=32 * 1024 * 1024),
    )(x_emb, mask_f, key_bias, params['emb_ln'], params['wqkv'], params['wo'],
      params['w1'], params['w2'], params['bias_tab'], blk, seg)


# ----------------------------- parameters (synthetic, deterministic) -----------------------------
def make_params(key):
    keys = iter(jax.random.split(key, 64))
    std = 0.02

    def w(shape):
        return (std * jax.random.normal(next(keys), shape)).astype(jnp.float32)

    def vec(n):
        return (std * jax.random.normal(next(keys), (n,))).astype(jnp.float32)

    def gamma(n):
        return (1.0 + 0.05 * jax.random.normal(next(keys), (n,))).astype(jnp.float32)

    def pad_row(v):
        return jnp.pad(v, (0, W3 - v.shape[0]))

    wqkv_l, wo_l, w1_l, w2_l, bias_l = [], [], [], [], []
    for _ in range(L):
        wqkv_l.append(jnp.concatenate([w((H, H)), w((H, H)), w((H, H))], axis=1))  # (H, 3H)
        wo_l.append(w((H, H)))
        w1_l.append(w((H, I)))
        w2_l.append(w((I, H)))
        rows = [pad_row(vec(W3)),    # 0: b_qkv  (3H)
                pad_row(vec(H)),     # 1: b_o
                pad_row(gamma(H)),   # 2: ln1 gamma
                pad_row(vec(H)),     # 3: ln1 beta
                pad_row(vec(I)),     # 4: b_ffn1 (I)
                pad_row(vec(H)),     # 5: b_ffn2
                pad_row(gamma(H)),   # 6: ln2 gamma
                pad_row(vec(H))]     # 7: ln2 beta
        bias_l.append(jnp.stack(rows))                                              # (8, 3H)

    return {
        'word_emb': w((V, H)),
        'pos_emb': w((S, H)),
        'type_emb': w((1, H)),
        'emb_ln': jnp.stack([gamma(H), vec(H)]),    # (2, H): [gamma, beta]
        'wqkv': jnp.stack(wqkv_l),                  # (L, H, 3H)
        'wo': jnp.stack(wo_l),                      # (L, H, H)
        'w1': jnp.stack(w1_l),                      # (L, H, I)
        'w2': jnp.stack(w2_l),                      # (L, I, H)
        'bias_tab': jnp.stack(bias_l),              # (L, 8, 3H)
    }


# ----------------------------- pure-JAX reference -----------------------------
def reference_forward(params, input_ids, attention_mask):
    mask_f = attention_mask.astype(jnp.float32)
    attn_bias = (1.0 - mask_f)[:, None, :] * jnp.float32(-1e9)        # (B, 1, S)
    scale = 1.0 / (HEAD_DIM ** 0.5)

    x = _embed(params, input_ids)                                     # (B, S, H)
    x = _layer_norm_ref(x, params['emb_ln'][0], params['emb_ln'][1])

    for l in range(L):
        wqkv = params['wqkv'][l]
        bt = params['bias_tab'][l]
        qkv = jnp.einsum('bsh,hd->bsd', x, wqkv) + bt[0]              # (B, S, 3H)
        q, k, v = qkv[..., :H], qkv[..., H:2 * H], qkv[..., 2 * H:]
        heads = []
        for h in range(NUM_HEADS):
            sl = slice(h * HEAD_DIM, (h + 1) * HEAD_DIM)
            s = jnp.einsum('bqd,bkd->bqk', q[..., sl], k[..., sl]) * scale + attn_bias
            p = jax.nn.softmax(s, axis=-1)
            heads.append(jnp.einsum('bqk,bkd->bqd', p, v[..., sl]))
        ctx = jnp.concatenate(heads, axis=-1)
        attn_out = jnp.einsum('bsh,hd->bsd', ctx, params['wo'][l]) + bt[1, :H]
        x1 = _layer_norm_ref(x + attn_out, bt[2, :H], bt[3, :H])
        hdn = _gelu(jnp.einsum('bsh,hi->bsi', x1, params['w1'][l]) + bt[4, :I])
        ffn = jnp.einsum('bsi,ih->bsh', hdn, params['w2'][l]) + bt[5, :H]
        x = _layer_norm_ref(x1 + ffn, bt[6, :H], bt[7, :H])

    m3 = mask_f[:, :, None]
    return jnp.sum(x * m3, axis=1) / jnp.maximum(jnp.sum(m3, axis=1), 1e-9)


# ----------------------------- main -----------------------------
if __name__ == "__main__":
    key = jax.random.PRNGKey(0)
    k_params, k_ids = jax.random.split(key)

    params = make_params(k_params)
    input_ids = jax.random.randint(k_ids, (B, S), 0, V, dtype=jnp.int32)
    attention_mask = jnp.array([[1, 1, 1, 1, 1, 1, 0, 0],
                                [1, 1, 1, 1, 0, 0, 0, 0]], dtype=jnp.int32)

    pooled = jax.jit(pallas_sentence_transformer_forward)(params, input_ids, attention_mask)
    pooled = jax.block_until_ready(pooled)

    ref = reference_forward(params, input_ids, attention_mask)
    assert pooled.shape == (B, H)
    max_diff = float(jnp.max(jnp.abs(pooled - ref)))
    # Tolerance leaves headroom for the EUP approx reciprocals (softmax / mean-pool denoms).
    assert jnp.allclose(pooled, ref, rtol=1e-3, atol=2e-3), (
        f"Pallas output mismatch vs reference (max |diff| = {max_diff})")

    print("KERNEL_OK")
</pallas_src>

<mosaic_0001>
module attributes {stable_mosaic.version = 11 : i64} {
  func.func @fused_forward_kernel(%arg0: memref<2x8x32xf32, #tpu.memory_space<vmem>>, %arg1: memref<2x8xf32, #tpu.memory_space<vmem>>, %arg2: memref<2x32xf32, #tpu.memory_space<vmem>>, %arg3: memref<2x32xf32, #tpu.memory_space<vmem>>, %arg4: memref<2x32x96xf32, #tpu.memory_space<vmem>>, %arg5: memref<2x32x32xf32, #tpu.memory_space<vmem>>, %arg6: memref<2x32x64xf32, #tpu.memory_space<vmem>>, %arg7: memref<2x64x32xf32, #tpu.memory_space<vmem>>, %arg8: memref<2x8x96xf32, #tpu.memory_space<vmem>>, %arg9: memref<32x32xf32, #tpu.memory_space<vmem>>, %arg10: memref<32x32xf32, #tpu.memory_space<vmem>>, %arg11: memref<2x32xf32, #tpu.memory_space<vmem>>) attributes {dimension_semantics = [], scalar_prefetch = 0 : i64, scratch_operands = 0 : i64, tpu.core_type = #tpu.core_type<tc>} {
    %c0 = arith.constant 0 : index
    %c0_0 = arith.constant 0 : index
    %c0_1 = arith.constant 0 : index
    %0 = vector.load %arg0[%c0, %c0_0, %c0_1] : memref<2x8x32xf32, #tpu.memory_space<vmem>>, vector<2x8x32xf32>
    %1 = vector.shape_cast %0 : vector<2x8x32xf32> to vector<16x32xf32>
    %c0_2 = arith.constant 0 : index
    %c0_3 = arith.constant 0 : index
    %2 = vector.load %arg1[%c0_2, %c0_3] : memref<2x8xf32, #tpu.memory_space<vmem>>, vector<2x8xf32>
    %c0_4 = arith.constant 0 : index
    %c0_5 = arith.constant 0 : index
    %3 = vector.load %arg2[%c0_4, %c0_5] : memref<2x32xf32, #tpu.memory_space<vmem>>, vector<2x32xf32>
    %4 = vector.shape_cast %3 : vector<2x32xf32> to vector<2x1x32xf32>
    %5 = vector.shape_cast %4 : vector<2x1x32xf32> to vector<2x1x32xf32>
    %6 = vector.broadcast %5 : vector<2x1x32xf32> to vector<2x8x32xf32>
    %c0_6 = arith.constant 0 : index
    %c0_7 = arith.constant 0 : index
    %7 = vector.load %arg9[%c0_6, %c0_7] : memref<32x32xf32, #tpu.memory_space<vmem>>, vector<32x32xf32>
    %8 = vector.shape_cast %7 : vector<32x32xf32> to vector<1x32x32xf32>
    %9 = vector.shape_cast %8 : vector<1x32x32xf32> to vector<1x32x32xf32>
    %10 = vector.broadcast %9 : vector<1x32x32xf32> to vector<2x32x32xf32>
    %c0_8 = arith.constant 0 : index
    %c0_9 = arith.constant 0 : index
    %11 = vector.load %arg10[%c0_8, %c0_9] : memref<32x32xf32, #tpu.memory_space<vmem>>, vector<32x32xf32>
    %c0_10 = arith.constant 0 : index
    %c0_11 = arith.constant 0 : index
    %12 = vector.load %arg3[%c0_10, %c0_11] : memref<2x32xf32, #tpu.memory_space<vmem>>, vector<1x32xf32>
    %c1 = arith.constant 1 : index
    %c0_12 = arith.constant 0 : index
    %13 = vector.load %arg3[%c1, %c0_12] : memref<2x32xf32, #tpu.memory_space<vmem>>, vector<1x32xf32>
    %cst = arith.constant dense<0.000000e+00> : vector<16xf32>
    %14 = vector.multi_reduction <add>, %1, %cst [1] : vector<16x32xf32> to vector<16xf32>
    %15 = vector.shape_cast %14 : vector<16xf32> to vector<16x1xf32>
    %cst_13 = arith.constant 3.125000e-02 : f32
    %16 = vector.broadcast %cst_13 : f32 to vector<16x1xf32>
    %17 = arith.mulf %15, %16 : vector<16x1xf32>
    %18 = arith.mulf %1, %1 : vector<16x32xf32>
    %cst_14 = arith.constant dense<0.000000e+00> : vector<16xf32>
    %19 = vector.multi_reduction <add>, %18, %cst_14 [1] : vector<16x32xf32> to vector<16xf32>
    %20 = vector.shape_cast %19 : vector<16xf32> to vector<16x1xf32>
    %cst_15 = arith.constant 3.125000e-02 : f32
    %21 = vector.broadcast %cst_15 : f32 to vector<16x1xf32>
    %22 = arith.mulf %20, %21 : vector<16x1xf32>
    %23 = arith.mulf %17, %17 : vector<16x1xf32>
    %24 = arith.subf %22, %23 : vector<16x1xf32>
    %cst_16 = arith.constant 0.000000e+00 : f32
    %25 = vector.broadcast %cst_16 : f32 to vector<16x1xf32>
    %26 = arith.maximumf %24, %25 : vector<16x1xf32>
    %27 = vector.broadcast %17 : vector<16x1xf32> to vector<16x32xf32>
    %28 = arith.subf %1, %27 : vector<16x32xf32>
    %cst_17 = arith.constant 9.99999996E-13 : f32
    %29 = vector.broadcast %cst_17 : f32 to vector<16x1xf32>
    %30 = arith.addf %26, %29 : vector<16x1xf32>
    %31 = math.rsqrt %30 : vector<16x1xf32>
    %32 = vector.broadcast %31 : vector<16x1xf32> to vector<16x32xf32>
    %33 = arith.mulf %28, %32 : vector<16x32xf32>
    %34 = vector.broadcast %12 : vector<1x32xf32> to vector<16x32xf32>
    %35 = arith.mulf %33, %34 : vector<16x32xf32>
    %36 = vector.broadcast %13 : vector<1x32xf32> to vector<16x32xf32>
    %37 = arith.addf %35, %36 : vector<16x32xf32>
    %c0_18 = arith.constant 0 : index
    %c0_19 = arith.constant 0 : index
    %c0_20 = arith.constant 0 : index
    %38 = vector.load %arg4[%c0_18, %c0_19, %c0_20] : memref<2x32x96xf32, #tpu.memory_space<vmem>>, vector<1x32x96xf32>
    %39 = vector.shape_cast %38 : vector<1x32x96xf32> to vector<32x96xf32>
    %c0_21 = arith.constant 0 : index
    %c0_22 = arith.constant 0 : index
    %c0_23 = arith.constant 0 : index
    %40 = vector.load %arg5[%c0_21, %c0_22, %c0_23] : memref<2x32x32xf32, #tpu.memory_space<vmem>>, vector<1x32x32xf32>
    %41 = vector.shape_cast %40 : vector<1x32x32xf32> to vector<32x32xf32>
    %c0_24 = arith.constant 0 : index
    %c0_25 = arith.constant 0 : index
    %c0_26 = arith.constant 0 : index
    %42 = vector.load %arg6[%c0_24, %c0_25, %c0_26] : memref<2x32x64xf32, #tpu.memory_space<vmem>>, vector<1x32x64xf32>
    %43 = vector.shape_cast %42 : vector<1x32x64xf32> to vector<32x64xf32>
    %c0_27 = arith.constant 0 : index
    %c0_28 = arith.constant 0 : index
    %c0_29 = arith.constant 0 : index
    %44 = vector.load %arg7[%c0_27, %c0_28, %c0_29] : memref<2x64x32xf32, #tpu.memory_space<vmem>>, vector<1x64x32xf32>
    %45 = vector.shape_cast %44 : vector<1x64x32xf32> to vector<64x32xf32>
    %c0_30 = arith.constant 0 : index
    %c0_31 = arith.constant 0 : index
    %c0_32 = arith.constant 0 : index
    %46 = vector.load %arg8[%c0_30, %c0_31, %c0_32] : memref<2x8x96xf32, #tpu.memory_space<vmem>>, vector<1x8x96xf32>
    %47 = vector.shape_cast %46 : vector<1x8x96xf32> to vector<8x96xf32>
    %48 = vector.extract_strided_slice %47 {offsets = [0, 0], sizes = [1, 96], strides = [1, 1]} : vector<8x96xf32> to vector<1x96xf32>
    %49 = vector.extract_strided_slice %47 {offsets = [1, 0], sizes = [1, 32], strides = [1, 1]} : vector<8x96xf32> to vector<1x32xf32>
    %50 = vector.extract_strided_slice %47 {offsets = [2, 0], sizes = [1, 32], strides = [1, 1]} : vector<8x96xf32> to vector<1x32xf32>
    %51 = vector.extract_strided_slice %47 {offsets = [3, 0], sizes = [1, 32], strides = [1, 1]} : vector<8x96xf32> to vector<1x32xf32>
    %52 = vector.extract_strided_slice %47 {offsets = [4, 0], sizes = [1, 64], strides = [1, 1]} : vector<8x96xf32> to vector<1x64xf32>
    %53 = vector.extract_strided_slice %47 {offsets = [5, 0], sizes = [1, 32], strides = [1, 1]} : vector<8x96xf32> to vector<1x32xf32>
    %54 = vector.extract_strided_slice %47 {offsets = [6, 0], sizes = [1, 32], strides = [1, 1]} : vector<8x96xf32> to vector<1x32xf32>
    %55 = vector.extract_strided_slice %47 {offsets = [7, 0], sizes = [1, 32], strides = [1, 1]} : vector<8x96xf32> to vector<1x32xf32>
    %cst_33 = arith.constant dense<0.000000e+00> : vector<16x96xf32>
    %56 = tpu.matmul %37, %39, %cst_33 {dimension_numbers = #tpu.dot_dimension_numbers<[1], [0], [0], [1], [0, 0, 1, 1], [], []>} : vector<16x32xf32>, vector<32x96xf32>, vector<16x96xf32> -> vector<16x96xf32>
    %57 = vector.broadcast %48 : vector<1x96xf32> to vector<16x96xf32>
    %58 = arith.addf %56, %57 : vector<16x96xf32>
    %59 = vector.extract_strided_slice %58 {offsets = [0, 0], sizes = [16, 32], strides = [1, 1]} : vector<16x96xf32> to vector<16x32xf32>
    %60 = vector.shape_cast %59 : vector<16x32xf32> to vector<2x8x32xf32>
    %61 = vector.extract_strided_slice %58 {offsets = [0, 32], sizes = [16, 32], strides = [1, 1]} : vector<16x96xf32> to vector<16x32xf32>
    %62 = vector.shape_cast %61 : vector<16x32xf32> to vector<2x8x32xf32>
    %63 = vector.extract_strided_slice %58 {offsets = [0, 64], sizes = [16, 32], strides = [1, 1]} : vector<16x96xf32> to vector<16x32xf32>
    %64 = vector.shape_cast %63 : vector<16x32xf32> to vector<2x8x32xf32>
    %65 = vector.shape_cast %62 : vector<2x8x32xf32> to vector<2x1x8x32xf32>
    %66 = vector.shape_cast %65 : vector<2x1x8x32xf32> to vector<2x1x8x32xf32>
    %67 = vector.broadcast %66 : vector<2x1x8x32xf32> to vector<2x4x8x32xf32>
    %68 = vector.shape_cast %67 : vector<2x4x8x32xf32> to vector<2x32x32xf32>
    %69 = arith.mulf %68, %10 : vector<2x32x32xf32>
    %70 = vector.shape_cast %64 : vector<2x8x32xf32> to vector<2x1x8x32xf32>
    %71 = vector.shape_cast %70 : vector<2x1x8x32xf32> to vector<2x1x8x32xf32>
    %72 = vector.broadcast %71 : vector<2x1x8x32xf32> to vector<2x4x8x32xf32>
    %73 = vector.shape_cast %72 : vector<2x4x8x32xf32> to vector<2x32x32xf32>
    %74 = arith.mulf %73, %10 : vector<2x32x32xf32>
    "tpu.trace_start"() <{level = 10 : i32, message = "bqh,bmh->bqm"}> : () -> ()
    %cst_34 = arith.constant dense<0.000000e+00> : vector<2x8x32xf32>
    %75 = tpu.matmul %60, %69, %cst_34 {dimension_numbers = #tpu.dot_dimension_numbers<[2], [2], [1], [1], [0, 0, 0, 1, 1, 1], [0], [0]>} : vector<2x8x32xf32>, vector<2x32x32xf32>, vector<2x8x32xf32> -> vector<2x8x32xf32>
    "tpu.trace_stop"() : () -> ()
    %cst_35 = arith.constant 0.353553385 : f32
    %76 = vector.broadcast %cst_35 : f32 to vector<2x8x32xf32>
    %77 = arith.mulf %75, %76 : vector<2x8x32xf32>
    %78 = arith.addf %77, %6 : vector<2x8x32xf32>
    %79 = math.exp %78 : vector<2x8x32xf32>
    %80 = vector.shape_cast %79 : vector<2x8x32xf32> to vector<16x32xf32>
    %cst_36 = arith.constant dense<0.000000e+00> : vector<16x32xf32>
    %81 = tpu.matmul %80, %11, %cst_36 {dimension_numbers = #tpu.dot_dimension_numbers<[1], [0], [0], [1], [0, 0, 1, 1], [], []>} : vector<16x32xf32>, vector<32x32xf32>, vector<16x32xf32> -> vector<16x32xf32>
    %82 = tpu.reciprocal %81 {approx = true} : vector<16x32xf32> -> vector<16x32xf32>
    %83 = arith.mulf %80, %82 : vector<16x32xf32>
    %84 = vector.shape_cast %83 : vector<16x32xf32> to vector<2x8x32xf32>
    "tpu.trace_start"() <{level = 10 : i32, message = "bqm,bmh->bqh"}> : () -> ()
    %cst_37 = arith.constant dense<0.000000e+00> : vector<2x8x32xf32>
    %85 = tpu.matmul %84, %74, %cst_37 {dimension_numbers = #tpu.dot_dimension_numbers<[2], [1], [1], [2], [0, 0, 0, 1, 1, 2], [0], [0]>} : vector<2x8x32xf32>, vector<2x32x32xf32>, vector<2x8x32xf32> -> vector<2x8x32xf32>
    "tpu.trace_stop"() : () -> ()
    %86 = vector.shape_cast %85 : vector<2x8x32xf32> to vector<16x32xf32>
    %cst_38 = arith.constant dense<0.000000e+00> : vector<16x32xf32>
    %87 = tpu.matmul %86, %41, %cst_38 {dimension_numbers = #tpu.dot_dimension_numbers<[1], [0], [0], [1], [0, 0, 1, 1], [], []>} : vector<16x32xf32>, vector<32x32xf32>, vector<16x32xf32> -> vector<16x32xf32>
    %88 = vector.broadcast %49 : vector<1x32xf32> to vector<16x32xf32>
    %89 = arith.addf %87, %88 : vector<16x32xf32>
    %90 = arith.addf %37, %89 : vector<16x32xf32>
    %cst_39 = arith.constant dense<0.000000e+00> : vector<16xf32>
    %91 = vector.multi_reduction <add>, %90, %cst_39 [1] : vector<16x32xf32> to vector<16xf32>
    %92 = vector.shape_cast %91 : vector<16xf32> to vector<16x1xf32>
    %cst_40 = arith.constant 3.125000e-02 : f32
    %93 = vector.broadcast %cst_40 : f32 to vector<16x1xf32>
    %94 = arith.mulf %92, %93 : vector<16x1xf32>
    %95 = arith.mulf %90, %90 : vector<16x32xf32>
    %cst_41 = arith.constant dense<0.000000e+00> : vector<16xf32>
    %96 = vector.multi_reduction <add>, %95, %cst_41 [1] : vector<16x32xf32> to vector<16xf32>
    %97 = vector.shape_cast %96 : vector<16xf32> to vector<16x1xf32>
    %cst_42 = arith.constant 3.125000e-02 : f32
    %98 = vector.broadcast %cst_42 : f32 to vector<16x1xf32>
    %99 = arith.mulf %97, %98 : vector<16x1xf32>
    %100 = arith.mulf %94, %94 : vector<16x1xf32>
    %101 = arith.subf %99, %100 : vector<16x1xf32>
    %cst_43 = arith.constant 0.000000e+00 : f32
    %102 = vector.broadcast %cst_43 : f32 to vector<16x1xf32>
    %103 = arith.maximumf %101, %102 : vector<16x1xf32>
    %104 = vector.broadcast %94 : vector<16x1xf32> to vector<16x32xf32>
    %105 = arith.subf %90, %104 : vector<16x32xf32>
    %cst_44 = arith.constant 9.99999996E-13 : f32
    %106 = vector.broadcast %cst_44 : f32 to vector<16x1xf32>
    %107 = arith.addf %103, %106 : vector<16x1xf32>
    %108 = math.rsqrt %107 : vector<16x1xf32>
    %109 = vector.broadcast %108 : vector<16x1xf32> to vector<16x32xf32>
    %110 = arith.mulf %105, %109 : vector<16x32xf32>
    %111 = vector.broadcast %50 : vector<1x32xf32> to vector<16x32xf32>
    %112 = arith.mulf %110, %111 : vector<16x32xf32>
    %113 = vector.broadcast %51 : vector<1x32xf32> to vector<16x32xf32>
    %114 = arith.addf %112, %113 : vector<16x32xf32>
    %cst_45 = arith.constant dense<0.000000e+00> : vector<16x64xf32>
    %115 = tpu.matmul %114, %43, %cst_45 {dimension_numbers = #tpu.dot_dimension_numbers<[1], [0], [0], [1], [0, 0, 1, 1], [], []>} : vector<16x32xf32>, vector<32x64xf32>, vector<16x64xf32> -> vector<16x64xf32>
    %116 = vector.broadcast %52 : vector<1x64xf32> to vector<16x64xf32>
    %117 = arith.addf %115, %116 : vector<16x64xf32>
    %118 = arith.mulf %117, %117 : vector<16x64xf32>
    %119 = arith.mulf %117, %118 : vector<16x64xf32>
    %cst_46 = arith.constant 4.471500e-02 : f32
    %120 = vector.broadcast %cst_46 : f32 to vector<16x64xf32>
    %121 = arith.mulf %120, %119 : vector<16x64xf32>
    %122 = arith.addf %117, %121 : vector<16x64xf32>
    %cst_47 = arith.constant 0.797884583 : f32
    %123 = vector.broadcast %cst_47 : f32 to vector<16x64xf32>
    %124 = arith.mulf %123, %122 : vector<16x64xf32>
    %125 = math.tanh %124 : vector<16x64xf32>
    %cst_48 = arith.constant 1.000000e+00 : f32
    %126 = vector.broadcast %cst_48 : f32 to vector<16x64xf32>
    %127 = arith.addf %126, %125 : vector<16x64xf32>
    %cst_49 = arith.constant 5.000000e-01 : f32
    %128 = vector.broadcast %cst_49 : f32 to vector<16x64xf32>
    %129 = arith.mulf %128, %127 : vector<16x64xf32>
    %130 = arith.mulf %117, %129 : vector<16x64xf32>
    %cst_50 = arith.constant dense<0.000000e+00> : vector<16x32xf32>
    %131 = tpu.matmul %130, %45, %cst_50 {dimension_numbers = #tpu.dot_dimension_numbers<[1], [0], [0], [1], [0, 0, 1, 1], [], []>} : vector<16x64xf32>, vector<64x32xf32>, vector<16x32xf32> -> vector<16x32xf32>
    %132 = vector.broadcast %53 : vector<1x32xf32> to vector<16x32xf32>
    %133 = arith.addf %131, %132 : vector<16x32xf32>
    %134 = arith.addf %114, %133 : vector<16x32xf32>
    %cst_51 = arith.constant dense<0.000000e+00> : vector<16xf32>
    %135 = vector.multi_reduction <add>, %134, %cst_51 [1] : vector<16x32xf32> to vector<16xf32>
    %136 = vector.shape_cast %135 : vector<16xf32> to vector<16x1xf32>
    %cst_52 = arith.constant 3.125000e-02 : f32
    %137 = vector.broadcast %cst_52 : f32 to vector<16x1xf32>
    %138 = arith.mulf %136, %137 : vector<16x1xf32>
    %139 = arith.mulf %134, %134 : vector<16x32xf32>
    %cst_53 = arith.constant dense<0.000000e+00> : vector<16xf32>
    %140 = vector.multi_reduction <add>, %139, %cst_53 [1] : vector<16x32xf32> to vector<16xf32>
    %141 = vector.shape_cast %140 : vector<16xf32> to vector<16x1xf32>
    %cst_54 = arith.constant 3.125000e-02 : f32
    %142 = vector.broadcast %cst_54 : f32 to vector<16x1xf32>
    %143 = arith.mulf %141, %142 : vector<16x1xf32>
    %144 = arith.mulf %138, %138 : vector<16x1xf32>
    %145 = arith.subf %143, %144 : vector<16x1xf32>
    %cst_55 = arith.constant 0.000000e+00 : f32
    %146 = vector.broadcast %cst_55 : f32 to vector<16x1xf32>
    %147 = arith.maximumf %145, %146 : vector<16x1xf32>
    %148 = vector.broadcast %138 : vector<16x1xf32> to vector<16x32xf32>
    %149 = arith.subf %134, %148 : vector<16x32xf32>
    %cst_56 = arith.constant 9.99999996E-13 : f32
    %150 = vector.broadcast %cst_56 : f32 to vector<16x1xf32>
    %151 = arith.addf %147, %150 : vector<16x1xf32>
    %152 = math.rsqrt %151 : vector<16x1xf32>
    %153 = vector.broadcast %152 : vector<16x1xf32> to vector<16x32xf32>
    %154 = arith.mulf %149, %153 : vector<16x32xf32>
    %155 = vector.broadcast %54 : vector<1x32xf32> to vector<16x32xf32>
    %156 = arith.mulf %154, %155 : vector<16x32xf32>
    %157 = vector.broadcast %55 : vector<1x32xf32> to vector<16x32xf32>
    %158 = arith.addf %156, %157 : vector<16x32xf32>
    %c1_57 = arith.constant 1 : index
    %c0_58 = arith.constant 0 : index
    %c0_59 = arith.constant 0 : index
    %159 = vector.load %arg4[%c1_57, %c0_58, %c0_59] : memref<2x32x96xf32, #tpu.memory_space<vmem>>, vector<1x32x96xf32>
    %160 = vector.shape_cast %159 : vector<1x32x96xf32> to vector<32x96xf32>
    %c1_60 = arith.constant 1 : index
    %c0_61 = arith.constant 0 : index
    %c0_62 = arith.constant 0 : index
    %161 = vector.load %arg5[%c1_60, %c0_61, %c0_62] : memref<2x32x32xf32, #tpu.memory_space<vmem>>, vector<1x32x32xf32>
    %162 = vector.shape_cast %161 : vector<1x32x32xf32> to vector<32x32xf32>
    %c1_63 = arith.constant 1 : index
    %c0_64 = arith.constant 0 : index
    %c0_65 = arith.constant 0 : index
    %163 = vector.load %arg6[%c1_63, %c0_64, %c0_65] : memref<2x32x64xf32, #tpu.memory_space<vmem>>, vector<1x32x64xf32>
    %164 = vector.shape_cast %163 : vector<1x32x64xf32> to vector<32x64xf32>
    %c1_66 = arith.constant 1 : index
    %c0_67 = arith.constant 0 : index
    %c0_68 = arith.constant 0 : index
    %165 = vector.load %arg7[%c1_66, %c0_67, %c0_68] : memref<2x64x32xf32, #tpu.memory_space<vmem>>, vector<1x64x32xf32>
    %166 = vector.shape_cast %165 : vector<1x64x32xf32> to vector<64x32xf32>
    %c1_69 = arith.constant 1 : index
    %c0_70 = arith.constant 0 : index
    %c0_71 = arith.constant 0 : index
    %167 = vector.load %arg8[%c1_69, %c0_70, %c0_71] : memref<2x8x96xf32, #tpu.memory_space<vmem>>, vector<1x8x96xf32>
    %168 = vector.shape_cast %167 : vector<1x8x96xf32> to vector<8x96xf32>
    %169 = vector.extract_strided_slice %168 {offsets = [0, 0], sizes = [1, 96], strides = [1, 1]} : vector<8x96xf32> to vector<1x96xf32>
    %170 = vector.extract_strided_slice %168 {offsets = [1, 0], sizes = [1, 32], strides = [1, 1]} : vector<8x96xf32> to vector<1x32xf32>
    %171 = vector.extract_strided_slice %168 {offsets = [2, 0], sizes = [1, 32], strides = [1, 1]} : vector<8x96xf32> to vector<1x32xf32>
    %172 = vector.extract_strided_slice %168 {offsets = [3, 0], sizes = [1, 32], strides = [1, 1]} : vector<8x96xf32> to vector<1x32xf32>
    %173 = vector.extract_strided_slice %168 {offsets = [4, 0], sizes = [1, 64], strides = [1, 1]} : vector<8x96xf32> to vector<1x64xf32>
    %174 = vector.extract_strided_slice %168 {offsets = [5, 0], sizes = [1, 32], strides = [1, 1]} : vector<8x96xf32> to vector<1x32xf32>
    %175 = vector.extract_strided_slice %168 {offsets = [6, 0], sizes = [1, 32], strides = [1, 1]} : vector<8x96xf32> to vector<1x32xf32>
    %176 = vector.extract_strided_slice %168 {offsets = [7, 0], sizes = [1, 32], strides = [1, 1]} : vector<8x96xf32> to vector<1x32xf32>
    %cst_72 = arith.constant dense<0.000000e+00> : vector<16x96xf32>
    %177 = tpu.matmul %158, %160, %cst_72 {dimension_numbers = #tpu.dot_dimension_numbers<[1], [0], [0], [1], [0, 0, 1, 1], [], []>} : vector<16x32xf32>, vector<32x96xf32>, vector<16x96xf32> -> vector<16x96xf32>
    %178 = vector.broadcast %169 : vector<1x96xf32> to vector<16x96xf32>
    %179 = arith.addf %177, %178 : vector<16x96xf32>
    %180 = vector.extract_strided_slice %179 {offsets = [0, 0], sizes = [16, 32], strides = [1, 1]} : vector<16x96xf32> to vector<16x32xf32>
    %181 = vector.shape_cast %180 : vector<16x32xf32> to vector<2x8x32xf32>
    %182 = vector.extract_strided_slice %179 {offsets = [0, 32], sizes = [16, 32], strides = [1, 1]} : vector<16x96xf32> to vector<16x32xf32>
    %183 = vector.shape_cast %182 : vector<16x32xf32> to vector<2x8x32xf32>
    %184 = vector.extract_strided_slice %179 {offsets = [0, 64], sizes = [16, 32], strides = [1, 1]} : vector<16x96xf32> to vector<16x32xf32>
    %185 = vector.shape_cast %184 : vector<16x32xf32> to vector<2x8x32xf32>
    %186 = vector.shape_cast %183 : vector<2x8x32xf32> to vector<2x1x8x32xf32>
    %187 = vector.shape_cast %186 : vector<2x1x8x32xf32> to vector<2x1x8x32xf32>
    %188 = vector.broadcast %187 : vector<2x1x8x32xf32> to vector<2x4x8x32xf32>
    %189 = vector.shape_cast %188 : vector<2x4x8x32xf32> to vector<2x32x32xf32>
    %190 = arith.mulf %189, %10 : vector<2x32x32xf32>
    %191 = vector.shape_cast %185 : vector<2x8x32xf32> to vector<2x1x8x32xf32>
    %192 = vector.shape_cast %191 : vector<2x1x8x32xf32> to vector<2x1x8x32xf32>
    %193 = vector.broadcast %192 : vector<2x1x8x32xf32> to vector<2x4x8x32xf32>
    %194 = vector.shape_cast %193 : vector<2x4x8x32xf32> to vector<2x32x32xf32>
    %195 = arith.mulf %194, %10 : vector<2x32x32xf32>
    "tpu.trace_start"() <{level = 10 : i32, message = "bqh,bmh->bqm"}> : () -> ()
    %cst_73 = arith.constant dense<0.000000e+00> : vector<2x8x32xf32>
    %196 = tpu.matmul %181, %190, %cst_73 {dimension_numbers = #tpu.dot_dimension_numbers<[2], [2], [1], [1], [0, 0, 0, 1, 1, 1], [0], [0]>} : vector<2x8x32xf32>, vector<2x32x32xf32>, vector<2x8x32xf32> -> vector<2x8x32xf32>
    "tpu.trace_stop"() : () -> ()
    %cst_74 = arith.constant 0.353553385 : f32
    %197 = vector.broadcast %cst_74 : f32 to vector<2x8x32xf32>
    %198 = arith.mulf %196, %197 : vector<2x8x32xf32>
    %199 = arith.addf %198, %6 : vector<2x8x32xf32>
    %200 = math.exp %199 : vector<2x8x32xf32>
    %201 = vector.shape_cast %200 : vector<2x8x32xf32> to vector<16x32xf32>
    %cst_75 = arith.constant dense<0.000000e+00> : vector<16x32xf32>
    %202 = tpu.matmul %201, %11, %cst_75 {dimension_numbers = #tpu.dot_dimension_numbers<[1], [0], [0], [1], [0, 0, 1, 1], [], []>} : vector<16x32xf32>, vector<32x32xf32>, vector<16x32xf32> -> vector<16x32xf32>
    %203 = tpu.reciprocal %202 {approx = true} : vector<16x32xf32> -> vector<16x32xf32>
    %204 = arith.mulf %201, %203 : vector<16x32xf32>
    %205 = vector.shape_cast %204 : vector<16x32xf32> to vector<2x8x32xf32>
    "tpu.trace_start"() <{level = 10 : i32, message = "bqm,bmh->bqh"}> : () -> ()
    %cst_76 = arith.constant dense<0.000000e+00> : vector<2x8x32xf32>
    %206 = tpu.matmul %205, %195, %cst_76 {dimension_numbers = #tpu.dot_dimension_numbers<[2], [1], [1], [2], [0, 0, 0, 1, 1, 2], [0], [0]>} : vector<2x8x32xf32>, vector<2x32x32xf32>, vector<2x8x32xf32> -> vector<2x8x32xf32>
    "tpu.trace_stop"() : () -> ()
    %207 = vector.shape_cast %206 : vector<2x8x32xf32> to vector<16x32xf32>
    %cst_77 = arith.constant dense<0.000000e+00> : vector<16x32xf32>
    %208 = tpu.matmul %207, %162, %cst_77 {dimension_numbers = #tpu.dot_dimension_numbers<[1], [0], [0], [1], [0, 0, 1, 1], [], []>} : vector<16x32xf32>, vector<32x32xf32>, vector<16x32xf32> -> vector<16x32xf32>
    %209 = vector.broadcast %170 : vector<1x32xf32> to vector<16x32xf32>
    %210 = arith.addf %208, %209 : vector<16x32xf32>
    %211 = arith.addf %158, %210 : vector<16x32xf32>
    %cst_78 = arith.constant dense<0.000000e+00> : vector<16xf32>
    %212 = vector.multi_reduction <add>, %211, %cst_78 [1] : vector<16x32xf32> to vector<16xf32>
    %213 = vector.shape_cast %212 : vector<16xf32> to vector<16x1xf32>
    %cst_79 = arith.constant 3.125000e-02 : f32
    %214 = vector.broadcast %cst_79 : f32 to vector<16x1xf32>
    %215 = arith.mulf %213, %214 : vector<16x1xf32>
    %216 = arith.mulf %211, %211 : vector<16x32xf32>
    %cst_80 = arith.constant dense<0.000000e+00> : vector<16xf32>
    %217 = vector.multi_reduction <add>, %216, %cst_80 [1] : vector<16x32xf32> to vector<16xf32>
    %218 = vector.shape_cast %217 : vector<16xf32> to vector<16x1xf32>
    %cst_81 = arith.constant 3.125000e-02 : f32
    %219 = vector.broadcast %cst_81 : f32 to vector<16x1xf32>
    %220 = arith.mulf %218, %219 : vector<16x1xf32>
    %221 = arith.mulf %215, %215 : vector<16x1xf32>
    %222 = arith.subf %220, %221 : vector<16x1xf32>
    %cst_82 = arith.constant 0.000000e+00 : f32
    %223 = vector.broadcast %cst_82 : f32 to vector<16x1xf32>
    %224 = arith.maximumf %222, %223 : vector<16x1xf32>
    %225 = vector.broadcast %215 : vector<16x1xf32> to vector<16x32xf32>
    %226 = arith.subf %211, %225 : vector<16x32xf32>
    %cst_83 = arith.constant 9.99999996E-13 : f32
    %227 = vector.broadcast %cst_83 : f32 to vector<16x1xf32>
    %228 = arith.addf %224, %227 : vector<16x1xf32>
    %229 = math.rsqrt %228 : vector<16x1xf32>
    %230 = vector.broadcast %229 : vector<16x1xf32> to vector<16x32xf32>
    %231 = arith.mulf %226, %230 : vector<16x32xf32>
    %232 = vector.broadcast %171 : vector<1x32xf32> to vector<16x32xf32>
    %233 = arith.mulf %231, %232 : vector<16x32xf32>
    %234 = vector.broadcast %172 : vector<1x32xf32> to vector<16x32xf32>
    %235 = arith.addf %233, %234 : vector<16x32xf32>
    %cst_84 = arith.constant dense<0.000000e+00> : vector<16x64xf32>
    %236 = tpu.matmul %235, %164, %cst_84 {dimension_numbers = #tpu.dot_dimension_numbers<[1], [0], [0], [1], [0, 0, 1, 1], [], []>} : vector<16x32xf32>, vector<32x64xf32>, vector<16x64xf32> -> vector<16x64xf32>
    %237 = vector.broadcast %173 : vector<1x64xf32> to vector<16x64xf32>
    %238 = arith.addf %236, %237 : vector<16x64xf32>
    %239 = arith.mulf %238, %238 : vector<16x64xf32>
    %240 = arith.mulf %238, %239 : vector<16x64xf32>
    %cst_85 = arith.constant 4.471500e-02 : f32
    %241 = vector.broadcast %cst_85 : f32 to vector<16x64xf32>
    %242 = arith.mulf %241, %240 : vector<16x64xf32>
    %243 = arith.addf %238, %242 : vector<16x64xf32>
    %cst_86 = arith.constant 0.797884583 : f32
    %244 = vector.broadcast %cst_86 : f32 to vector<16x64xf32>
    %245 = arith.mulf %244, %243 : vector<16x64xf32>
    %246 = math.tanh %245 : vector<16x64xf32>
    %cst_87 = arith.constant 1.000000e+00 : f32
    %247 = vector.broadcast %cst_87 : f32 to vector<16x64xf32>
    %248 = arith.addf %247, %246 : vector<16x64xf32>
    %cst_88 = arith.constant 5.000000e-01 : f32
    %249 = vector.broadcast %cst_88 : f32 to vector<16x64xf32>
    %250 = arith.mulf %249, %248 : vector<16x64xf32>
    %251 = arith.mulf %238, %250 : vector<16x64xf32>
    %cst_89 = arith.constant dense<0.000000e+00> : vector<16x32xf32>
    %252 = tpu.matmul %251, %166, %cst_89 {dimension_numbers = #tpu.dot_dimension_numbers<[1], [0], [0], [1], [0, 0, 1, 1], [], []>} : vector<16x64xf32>, vector<64x32xf32>, vector<16x32xf32> -> vector<16x32xf32>
    %253 = vector.broadcast %174 : vector<1x32xf32> to vector<16x32xf32>
    %254 = arith.addf %252, %253 : vector<16x32xf32>
    %255 = arith.addf %235, %254 : vector<16x32xf32>
    %cst_90 = arith.constant dense<0.000000e+00> : vector<16xf32>
    %256 = vector.multi_reduction <add>, %255, %cst_90 [1] : vector<16x32xf32> to vector<16xf32>
    %257 = vector.shape_cast %256 : vector<16xf32> to vector<16x1xf32>
    %cst_91 = arith.constant 3.125000e-02 : f32
    %258 = vector.broadcast %cst_91 : f32 to vector<16x1xf32>
    %259 = arith.mulf %257, %258 : vector<16x1xf32>
    %260 = arith.mulf %255, %255 : vector<16x32xf32>
    %cst_92 = arith.constant dense<0.000000e+00> : vector<16xf32>
    %261 = vector.multi_reduction <add>, %260, %cst_92 [1] : vector<16x32xf32> to vector<16xf32>
    %262 = vector.shape_cast %261 : vector<16xf32> to vector<16x1xf32>
    %cst_93 = arith.constant 3.125000e-02 : f32
    %263 = vector.broadcast %cst_93 : f32 to vector<16x1xf32>
    %264 = arith.mulf %262, %263 : vector<16x1xf32>
    %265 = arith.mulf %259, %259 : vector<16x1xf32>
    %266 = arith.subf %264, %265 : vector<16x1xf32>
    %cst_94 = arith.constant 0.000000e+00 : f32
    %267 = vector.broadcast %cst_94 : f32 to vector<16x1xf32>
    %268 = arith.maximumf %266, %267 : vector<16x1xf32>
    %269 = vector.broadcast %259 : vector<16x1xf32> to vector<16x32xf32>
    %270 = arith.subf %255, %269 : vector<16x32xf32>
    %cst_95 = arith.constant 9.99999996E-13 : f32
    %271 = vector.broadcast %cst_95 : f32 to vector<16x1xf32>
    %272 = arith.addf %268, %271 : vector<16x1xf32>
    %273 = math.rsqrt %272 : vector<16x1xf32>
    %274 = vector.broadcast %273 : vector<16x1xf32> to vector<16x32xf32>
    %275 = arith.mulf %270, %274 : vector<16x32xf32>
    %276 = vector.broadcast %175 : vector<1x32xf32> to vector<16x32xf32>
    %277 = arith.mulf %275, %276 : vector<16x32xf32>
    %278 = vector.broadcast %176 : vector<1x32xf32> to vector<16x32xf32>
    %279 = arith.addf %277, %278 : vector<16x32xf32>
    %280 = vector.shape_cast %279 : vector<16x32xf32> to vector<2x8x32xf32>
    %281 = vector.shape_cast %2 : vector<2x8xf32> to vector<2x8x1xf32>
    %282 = vector.broadcast %281 : vector<2x8x1xf32> to vector<2x8x32xf32>
    %283 = arith.mulf %280, %282 : vector<2x8x32xf32>
    %cst_96 = arith.constant dense<0.000000e+00> : vector<2x32xf32>
    %284 = vector.multi_reduction <add>, %283, %cst_96 [1] : vector<2x8x32xf32> to vector<2x32xf32>
    %cst_97 = arith.constant dense<0.000000e+00> : vector<2xf32>
    %285 = vector.multi_reduction <add>, %2, %cst_97 [1] : vector<2x8xf32> to vector<2xf32>
    %286 = vector.shape_cast %285 : vector<2xf32> to vector<2x1xf32>
    %cst_98 = arith.constant 9.99999971E-10 : f32
    %287 = vector.broadcast %cst_98 : f32 to vector<2x1xf32>
    %288 = arith.maximumf %286, %287 : vector<2x1xf32>
    %289 = tpu.reciprocal %288 {approx = true} : vector<2x1xf32> -> vector<2x1xf32>
    %290 = vector.broadcast %289 : vector<2x1xf32> to vector<2x32xf32>
    %291 = arith.mulf %284, %290 : vector<2x32xf32>
    %c0_99 = arith.constant 0 : index
    %c0_100 = arith.constant 0 : index
    %292 = vector.load %arg11[%c0_99, %c0_100] : memref<2x32xf32, #tpu.memory_space<vmem>>, vector<2x32xf32>
    tpu.vector_store %arg11[%c0_99, %c0_100], %291 {strides = array<i32>} : memref<2x32xf32, #tpu.memory_space<vmem>>, vector<2x32xf32>,
    return
  }
}

</mosaic_0001>

<bundles_post_ra>
// kernel: tile.9
= control target key start
LH: loop header
LB: loop body
LE: loop exit
PB: predicated region body
PF: predicated region fallthrough
CT: control target
= control target key end

     0   :  { %s29_s10 = smov 3  ;;  %s10_s11 = smov 3  ;;  %vm12_vm0 = vcmask 64512   ;;  %vm19_vm1 = vcmask 261312   ;;  %vm26_vm2 = vcmask 195712   ;;  %vm33_vm3 = vcmask 130112   ;;  %s67_s0 = inlined_call_operand.vmem [shape: f32[2,4,8], index: 0, kind: input, shape index: {}]   ;;  %s68_s1 = inlined_call_operand.vmem [shape: f32[2,32], index: 1, kind: output, shape index: {}]  }
   0x1   :  { %v41_v0 = vld [vmem:[%s67_s0 + $0x4] sm:$0xf]  ;;  %v8_v1 = vld [vmem:[%s67_s0] sm:$0xf]  ;;  %s15_s0 = smov 3  ;;  %s22_s12 = smov 3 }
   0x2   :  { %7 = vst [vmem:[#allocation1 + $0x8] sm:$0xf] %v41_v0  ;;  %9 = vst [vmem:[#allocation1] sm:$0xf] %v8_v1  ;;  %s45_s13 = smov 24   ;;  %s46_s14 = smov 8  }
   0x3   :  { %s47_s15 = smov 16  }
   0x9   :  { %v16_v2 = vld [vmem:[#allocation1 + $0x3] ss:$8 sm:%s15_s0]   ;;  %v30_v3 = vld [vmem:[#allocation1 + $0x1] ss:$8 sm:%s29_s10]   ;;  %v11_v4 = vld [vmem:[#allocation1] ss:$8 sm:%s10_s11]  }
   0xa   :  { %17 = vrot.lane.b32.xlu0 %v16_v2, %s45_s13  ;;  %31 = vrot.lane.b32.xlu1 %v30_v3, %s46_s14  ;;  %v23_v5 = vld [vmem:[#allocation1 + $0x2] ss:$8 sm:%s22_s12]   ;;  %13 = vst.msk [vmem:[#allocation0] sm:$0x3] %vm12_vm0, %v11_v4  }
   0xe   :  { %24 = vrot.lane.b32.xlu0 %v23_v5, %s47_s15 }
  0x7c   :  { %v18_v6 = vpop.permute.xlu0 %17   ;;  %v32_v7 = vpop.permute.xlu1 %31  }
  0x7d   :  { %20 = vst.msk [vmem:[#allocation0] sm:$0x3] %vm19_vm1, %v18_v6  }
  0x80   :  { %v25_v8 = vpop.permute.xlu0 %24  }
  0x81   :  { %27 = vst.msk [vmem:[#allocation0] sm:$0x3] %vm26_vm2, %v25_v8  }
  0x82   :  { %34 = vst.msk [vmem:[#allocation0] sm:$0x3] %vm33_vm3, %v32_v7  }
  0x89   :  { %v38_v9 = vld [vmem:[#allocation0] sm:$0x3] }
  0x8a   :  { %40 = vst [vmem:[%s68_s1] sm:$0x3] %v38_v9 }

// kernel: pallas_sentence_transformer_forward.1
= control target key start
LH: loop header
LB: loop body
LE: loop exit
PB: predicated region body
PF: predicated region fallthrough
CT: control target
= control target key end

     0   :  { %vm86_vm0 = vcmask 261120   ;;  %s3404_s0 = inlined_call_operand.vmem [shape: f32[2,8,32], index: 0, kind: input, shape index: {}]   ;;  %s3405_s1 = inlined_call_operand.vmem [shape: f32[2,8], index: 1, kind: input, shape index: {}]   ;;  %s3406_s2 = inlined_call_operand.vmem [shape: f32[2,32], index: 2, kind: input, shape index: {}]   ;;  %s3407_s3 = inlined_call_operand.vmem [shape: f32[2,32], index: 3, kind: input, shape index: {}]   ;;  %s3408_s4 = inlined_call_operand.vmem [shape: f32[2,32,96], index: 4, kind: input, shape index: {}]   ;;  %s3409_s5 = inlined_call_operand.vmem [shape: f32[2,32,32], index: 5, kind: input, shape index: {}]   ;;  %s3410_s6 = inlined_call_operand.vmem [shape: f32[2,32,64], index: 6, kind: input, shape index: {}]   ;;  %s3411_s7 = inlined_call_operand.vmem [shape: f32[2,64,32], index: 7, kind: input, shape index: {}]   ;;  %s3412_s8 = inlined_call_operand.vmem [shape: f32[2,8,96], index: 8, kind: input, shape index: {}]   ;;  %s3413_s9 = inlined_call_operand.vmem [shape: f32[32,32], index: 9, kind: input, shape index: {}, may-alias: {9,10}]   ;;  %s3414_s10 = inlined_call_operand.vmem [shape: f32[32,32], index: 10, kind: input, shape index: {}, may-alias: {9,10}]   ;;  %s3415_s11 = inlined_call_operand.hbm [shape: f32[2,32], index: 11, kind: output, shape index: {}]  }
   0x1   :  { %v39_v0 = vld [vmem:[%s3404_s0] sm:$0xff]  ;;  %v40_v1 = vld [vmem:[%s3404_s0 + $0x8] sm:$0xff] }
   0x2   :  { %16 = vsyncpa [#allocation3], 0  ;;  %v87_v2 = vsel %vm86_vm0, %v39_v0, 0.0  ;;  %v95_v3 = vmul.f32 %v39_v0, %v39_v0  ;;  %v96_v4 = vmul.f32 %v40_v1, %v40_v1  ;;  %v90_v6 = vsel %vm86_vm0, %v40_v1, 0.0  ;;  %v131_v8 = vld [vmem:[%s3408_s4] sm:$0xff]  ;;  %v132_v9 = vld [vmem:[%s3408_s4 + $0x8] sm:$0xff] }
   0x3   :  { %88 = vadd.xlane.f32.xlu0 %v87_v2  ;;  %v133_v10 = vld [vmem:[%s3408_s4 + $0x10] sm:$0xff]  ;;  %v2507_v11 = vpack.c.bf16 %v132_v9, %v131_v8  ;;  %v134_v12 = vld [vmem:[%s3408_s4 + $0x18] sm:$0xff]  ;;  %v2910_v14 = vld [vmem:[%s3413_s9 + $0x8] sm:$0xff]  ;;  %s2817_s30 = smov 32   ;;  %v55_v46 = vlaneseq  ;;  %v2818_v53 = vmov 0.0|0.0   ;;  %s2819_s22 = smov 96  }
   0x4   :  { %v97_v5 = vsel %vm86_vm0, %v95_v3, 0.0  ;;  %v100_v7 = vsel %vm86_vm0, %v96_v4, 0.0  ;;  %v2511_v13 = vpack.c.bf16 %v134_v12, %v133_v10  ;;  %v2916_v15 = vld [vmem:[%s3413_s9] sm:$0xff]  ;;  %v2921_v16 = vld [vmem:[%s3413_s9 + $0x10] sm:$0xff]  ;;  %v2928_v17 = vld [vmem:[%s3413_s9 + $0x18] sm:$0xff]  ;;  %2523 = vmatprep.subr.bf16.mxu0 %v2818_v53  ;;  %vm2820_vm1 = vmmov 0  }
   0x5   :  { %98 = vadd.xlane.f32.xlu1 %v97_v5  ;;  %2508 = vmatprep.subr.bf16.mxu1 %v2507_v11  ;;  %v2118_v36 = vld [vmem:[%s3407_s3] ss:$0 sm:$0xff]  ;;  %v2119_v38 = vld [vmem:[%s3407_s3 + $0x1] ss:$0 sm:$0xff]  ;;  %v2945_v47 = vshrl.u32 %v55_v46, 7  ;;  %v2821_v8 = vmov 0.0   ;;  %vm3005_vm2 = vmpackc.low %vm86_vm0, %vm86_vm0 }
   0x6   :  { %2510 = vmatpush3.bf16.msra.mxu1 %v2507_v11  ;;  %v2955_v50 = vld [vmem:[%s3412_s8] sm:$0xff]  ;;  %2323 = vmatprep.mubr.msk.f32.mxu0 %vm2820_vm1, %v2821_v8  ;;  %s2822_s0 = smov 64   ;;  %v82_v46 = vld [vmem:[%s3414_s10 + $0x10] sm:$0xff]  ;;  %vm976_vm3 = vcmask 523264   ;;  %vm2083_vm4 = vcmask 58368   ;;  %vm2098_vm5 = vcmask 1041409  }
   0x7   :  { %91 = vadd.xlane.f32.xlu0 %v90_v6  ;;  %2512 = vmatprep.subr.bf16.mxu1 %v2511_v13  ;;  %v2950_v49 = vsub.s32 0, %v2945_v47  ;;  %vm2101_vm6 = vcmask 254976  }
   0x9   :  { %101 = vadd.xlane.f32.xlu1 %v100_v7  ;;  %v155_v52 = vrot.slane %v2955_v50, %v2950_v49 }
   0xa   :  { %2514 = vmatpush3.bf16.msra.mxu1 %v2511_v13 }
   0xb   :  { %2515 = vmatprep.subr.bf16.mxu1 %v2818_v53 }
  0x1a   :  { %243 = vrot.lane.b32.xlu1 %v2910_v14, %s2817_s30 }
  0x1d   :  { %241 = vrot.lane.b32.xlu0 %v2916_v15, %s2817_s30 }
  0x1e   :  { %245 = vrot.lane.b32.xlu1 %v2921_v16, %s2817_s30 }
  0x22   :  { %247 = vrot.lane.b32.xlu1 %v2928_v17, %s2817_s30 }
  0x90   :  { %v89_v18 = vpop.xlane.xlu0 %88 }
  0x91   :  { %v93_v19 = vmul.f32 0.03125, %v89_v18 }
  0x92   :  { %v99_v20 = vpop.xlane.xlu1 %98 }
  0x93   :  { %v105_v21 = vmul.f32 %v93_v19, %v93_v19  ;;  %v103_v22 = vmul.f32 0.03125, %v99_v20  ;;  %v111_v34 = vsub.f32 %v39_v0, %v93_v19 }
  0x94   :  { %v92_v23 = vpop.xlane.xlu0 %91 }
  0x95   :  { %v107_v24 = vsub.f32 %v103_v22, %v105_v21  ;;  %v94_v25 = vmul.f32 0.03125, %v92_v23 }
  0x96   :  { %v102_v26 = vpop.xlane.xlu1 %101 }
  0x97   :  { %v109_v27 = vmax.f32 %v107_v24, 0.0  ;;  %v106_v28 = vmul.f32 %v94_v25, %v94_v25  ;;  %v104_v29 = vmul.f32 0.03125, %v102_v26  ;;  %v112_v39 = vsub.f32 %v40_v1, %v94_v25 }
  0x98   :  { %v2963_v55 = vpop.permute.xlu0 %241 }
  0x99   :  { %v113_v30 = vadd.f32 1e-12, %v109_v27  ;;  %v108_v31 = vsub.f32 %v104_v29, %v106_v28 }
  0x9a   :  { %v2947_v48 = vpop.permute.xlu1 %243 }
  0x9b   :  { %2747 = vrsqrt.f32 %v113_v30  ;;  %v110_v32 = vmax.f32 %v108_v31, 0.0 }
  0x9d   :  { %v114_v33 = vadd.f32 1e-12, %v110_v32 }
  0x9e   :  { %v2957_v51 = vpop.permute.xlu1 %245 }
  0x9f   :  { %2749 = vrsqrt.f32 %v114_v33 }
  0xa2   :  { %v2969_v59 = vpop.permute.xlu1 %247 }
  0xa5   :  { %v2748_v35 = vpop.eup %2747 }
  0xa6   :  { %v117_v37 = vmul.f32 %v2748_v35, %v111_v34 }
  0xa8   :  { %v123_v40 = vmul.f32 %v2118_v36, %v117_v37 }
  0xa9   :  { %v2750_v41 = vpop.eup %2749 }
  0xaa   :  { %v118_v42 = vmul.f32 %v2750_v41, %v112_v39  ;;  %v2937_v43 = vadd.f32 %v2119_v38, %v123_v40 }
  0xac   :  { %v124_v44 = vmul.f32 %v2118_v36, %v118_v42  ;;  %2301 = vmatprep.mubr.msk.f32.mxu1 %vm86_vm0, %v2937_v43  ;;  %v80_v42 = vld [vmem:[%s3414_s10] sm:$0xff] }
  0xae   :  { %v2941_v45 = vadd.f32 %v2119_v38, %v124_v44  ;;  %v81_v44 = vld [vmem:[%s3414_s10 + $0x8] sm:$0xff] }
  0xb0   :  { %2302 = vmatmul.mubr.msk.f32.vlgmr.msra.gmra.mrb[0].mxu1 %vm86_vm0, %v2941_v45 }
  0xb1   :  { %2312 = vmatprep.mubr.msk.f32.mxu1 %vm2820_vm1, %v2821_v8 }
 0x183   :  { %v2303_v54 = vpop.f32.mrb[0].mxu1 }
 0x184   :  { %v2965_v56 = vadd.f32 %v2303_v54, %v155_v52  ;;  %v228_v57 = vpop.f32.mrb[1].mxu1  ;;  %v83_v54 = vld [vmem:[%s3414_s10 + $0x18] sm:$0xff] }
 0x185   :  { %v2967_v58 = vadd.f32 %v228_v57, %v155_v52  ;;  %v3063_v52 = vpack.c.bf16 %v81_v44, %v80_v42  ;;  %v137_v44 = vld [vmem:[%s3409_s5 + $0x10] sm:$0xff] }
 0x186   :  { %v257_v60 = vmul.f32 %v2963_v55, %v2965_v56  ;;  %v258_v61 = vmul.f32 %v2947_v48, %v2965_v56  ;;  %v260_v0 = vmul.f32 %v2969_v59, %v2965_v56  ;;  %v259_v2 = vmul.f32 %v2957_v51, %v2965_v56 }
 0x187   :  { %v253_v62 = vmul.f32 %v2963_v55, %v2967_v58  ;;  %v254_v63 = vmul.f32 %v2947_v48, %v2967_v58  ;;  %v256_v3 = vmul.f32 %v2969_v59, %v2967_v58  ;;  %v255_v5 = vmul.f32 %v2957_v51, %v2967_v58 }
 0x188   :  { %v2672_v1 = vpack.i.bf16 %v258_v61, %v257_v60  ;;  %v2682_v6 = vpack.i.bf16 %v260_v0, %v259_v2  ;;  %v2823_v2 = vmov 1966171168  }
 0x189   :  { %v2667_v4 = vpack.i.bf16 %v254_v63, %v253_v62  ;;  %v2677_v7 = vpack.i.bf16 %v256_v3, %v255_v5  ;;  %v53_v3 = vunpack.c.l.s4 %v2823_v2  ;;  %v2117_v5 = vld.sshfl [vmem:[%s3406_s2] sm:$0x11 pattern:$0x75316420]  ;;  %v3110_v2 = vsub.s32 1, %v2945_v47 }
 0x18a   :  { %2673 = vrot.lane.b32.xlu1 %v2672_v1, %s2819_s22 }
 0x18b   :  { %2668 = vrot.lane.b32.xlu0 %v2667_v4, %s2819_s22  ;;  %v54_v4 = vunpack.c.0.s8 %v53_v3  ;;  %v741_v3 = vrot.slane %v2955_v50, %v3110_v2 }
 0x18e   :  { %2683 = vrot.lane.b32.xlu1 %v2682_v6, %s2819_s22  ;;  %v51_v6 = vcombine.high %v2117_v5, %v2117_v5 }
 0x18f   :  { %2678 = vrot.lane.b32.xlu0 %v2677_v7, %s2819_s22  ;;  %v57_v7 = vsub.s32 %v54_v4, %v2945_v47 }
 0x192   :  { %263 = vrot.lane.b32.xlu1 %v2910_v14, %s2822_s0 }
 0x193   :  { %261 = vrot.lane.b32.xlu0 %v2916_v15, %s2822_s0 }
 0x196   :  { %267 = vrot.lane.b32.xlu1 %v2928_v17, %s2822_s0 }
 0x197   :  { %265 = vrot.lane.b32.xlu0 %v2921_v16, %s2822_s0 }
 0x1fc   :  { %v2674_v9 = vpop.permute.xlu1 %2673 }
 0x1fd   :  { %v2676_v10 = vunpack.i.h.bf16 %v2674_v9  ;;  %v2675_v11 = vunpack.i.l.bf16 %v2674_v9  ;;  %v2669_v12 = vpop.permute.xlu0 %2668  ;;  %v65_v9 = vrot.slane %v51_v6, %v57_v7 }
 0x1fe   :  { %v2671_v13 = vunpack.i.h.bf16 %v2669_v12  ;;  %v2670_v18 = vunpack.i.l.bf16 %v2669_v12 }
 0x1ff   :  { %v2524_v14 = vpack.c.bf16 %v2676_v10, %v2675_v11  ;;  %v58_v10 = vrot.slane %v2117_v5, %v57_v7  ;;  %v3081_v11 = vrot.slane %v65_v9, %v2950_v49 }
 0x200   :  { %v2516_v15 = vpack.c.bf16 %v2671_v13, %v2670_v18  ;;  %v2684_v20 = vpop.permute.xlu1 %2683 }
 0x201   :  { %2526 = vmatpush3.bf16.xpose.msk.msra.mxu0 %vm3005_vm2, %v2524_v14  ;;  %v2679_v17 = vpop.permute.xlu0 %2678  ;;  %v2686_v16 = vunpack.i.h.bf16 %v2684_v20  ;;  %v2685_v21 = vunpack.i.l.bf16 %v2684_v20  ;;  %v3084_v18 = vrot.slane %v58_v10, %v2950_v49 }
 0x202   :  { %2518 = vmatpush3.bf16.xpose.msk.msra.mxu1 %vm3005_vm2, %v2516_v15  ;;  %2527 = vmatprep.subr.bf16.mxu0 %v2818_v53  ;;  %v2681_v23 = vunpack.i.h.bf16 %v2679_v17  ;;  %v2680_v24 = vunpack.i.l.bf16 %v2679_v17 }
 0x203   :  { %2519 = vmatprep.subr.bf16.mxu1 %v2818_v53  ;;  %v2528_v30 = vpack.c.bf16 %v2686_v16, %v2685_v21 }
 0x204   :  { %v3015_v22 = vpop.permute.xlu1 %263  ;;  %v2520_v34 = vpack.c.bf16 %v2681_v23, %v2680_v24 }
 0x205   :  { %v274_v25 = vmul.f32 %v3015_v22, %v2967_v58  ;;  %v278_v26 = vmul.f32 %v3015_v22, %v2965_v56  ;;  %v3021_v27 = vpop.permute.xlu0 %261 }
 0x206   :  { %v273_v28 = vmul.f32 %v3021_v27, %v2967_v58  ;;  %v277_v29 = vmul.f32 %v3021_v27, %v2965_v56 }
 0x208   :  { %v3027_v31 = vpop.permute.xlu1 %267  ;;  %v2687_v32 = vpack.i.bf16 %v278_v26, %v277_v29  ;;  %v2692_v33 = vpack.i.bf16 %v274_v25, %v273_v28 }
 0x209   :  { %v276_v35 = vmul.f32 %v3027_v31, %v2967_v58  ;;  %v280_v36 = vmul.f32 %v3027_v31, %v2965_v56  ;;  %2530 = vmatpush3.bf16.xpose.msk.msra.mxu0 %vm3005_vm2, %v2528_v30  ;;  %v3035_v37 = vpop.permute.xlu0 %265 }
 0x20a   :  { %v275_v38 = vmul.f32 %v3035_v37, %v2967_v58  ;;  %v279_v39 = vmul.f32 %v3035_v37, %v2965_v56  ;;  %2688 = vrot.lane.b32.xlu1 %v2687_v32, %s2822_s0  ;;  %2693 = vrot.lane.b32.xlu0 %v2692_v33, %s2822_s0 }
 0x20b   :  { %2522 = vmatpush3.bf16.xpose.msk.msra.mxu1 %vm3005_vm2, %v2520_v34  ;;  %2539 = vmatprep.subr.bf16.mxu0 %v2818_v53 }
 0x20c   :  { %v2702_v40 = vpack.i.bf16 %v280_v36, %v279_v39  ;;  %v2697_v41 = vpack.i.bf16 %v276_v35, %v275_v38  ;;  %2532 = vmatprep.subr.bf16.mxu1 %v3063_v52  ;;  %v135_v38 = vld [vmem:[%s3409_s5] sm:$0xff]  ;;  %v136_v39 = vld [vmem:[%s3409_s5 + $0x8] sm:$0xff] }
 0x20e   :  { %2703 = vrot.lane.b32.xlu1 %v2702_v40, %s2822_s0  ;;  %2698 = vrot.lane.b32.xlu0 %v2697_v41, %s2822_s0  ;;  %v2551_v40 = vpack.c.bf16 %v136_v39, %v135_v38 }
 0x210   :  { %2324 = vmatmul.mubr.msk.f32.vlgmr.msra.gmra.mrb[0].mxu0 %vm86_vm0, %v2965_v56  ;;  %v3068_v56 = vpack.c.bf16 %v83_v54, %v82_v46  ;;  %v138_v46 = vld [vmem:[%s3409_s5 + $0x18] sm:$0xff] }
 0x211   :  { %2345 = vmatprep.mubr.msk.f32.mxu0 %vm2820_vm1, %v2821_v8 }
 0x212   :  { %2313 = vmatmul.mubr.msk.f32.vlgmr.msra.gmra.mrb[2].mxu1 %vm86_vm0, %v2967_v58 }
 0x213   :  { %2534 = vmatpush3.bf16.msra.mxu1 %v3063_v52 }
 0x214   :  { %2536 = vmatprep.subr.bf16.mxu1 %v3068_v56 }
 0x217   :  { %2538 = vmatpush3.bf16.msra.mxu1 %v3068_v56 }
 0x218   :  { %2545 = vmatprep.subr.bf16.mxu1 %v2818_v53 }
 0x27c   :  { %v2694_v57 = vpop.permute.xlu0 %2693  ;;  %v2689_v25 = vpop.permute.xlu1 %2688 }
 0x27d   :  { %v2696_v58 = vunpack.i.h.bf16 %v2694_v57  ;;  %v2695_v60 = vunpack.i.l.bf16 %v2694_v57  ;;  %v2691_v26 = vunpack.i.h.bf16 %v2689_v25  ;;  %v2690_v28 = vunpack.i.l.bf16 %v2689_v25 }
 0x27f   :  { %v2540_v61 = vpack.c.bf16 %v2696_v58, %v2695_v60  ;;  %v2546_v33 = vpack.c.bf16 %v2691_v26, %v2690_v28 }
 0x280   :  { %v2699_v62 = vpop.permute.xlu0 %2698  ;;  %v2704_v29 = vpop.permute.xlu1 %2703 }
 0x281   :  { %v2701_v63 = vunpack.i.h.bf16 %v2699_v62  ;;  %v2700_v0 = vunpack.i.l.bf16 %v2699_v62  ;;  %2541 = vmatpush3.bf16.msra.mxu0 %v2540_v61  ;;  %v2706_v34 = vunpack.i.h.bf16 %v2704_v29  ;;  %v2705_v35 = vunpack.i.l.bf16 %v2704_v29 }
 0x282   :  { %2542 = vmatprep.subr.bf16.mxu0 %v2818_v53  ;;  %v2555_v61 = vpack.c.bf16 %v138_v46, %v137_v44  ;;  %v859_v46 = vsub.s32 2, %v2945_v47 }
 0x283   :  { %v2543_v1 = vpack.c.bf16 %v2701_v63, %v2700_v0  ;;  %v2549_v36 = vpack.c.bf16 %v2706_v34, %v2705_v35 }
 0x285   :  { %2544 = vmatpush3.bf16.msra.mxu0 %v2543_v1 }
 0x286   :  { %2552 = vmatprep.subr.bf16.mxu0 %v2551_v40 }
 0x2e3   :  { %v463_v12 = vpop.f32.mrb[0].mxu0 }
 0x2e4   :  { %v468_v13 = vmul.f32 0.35355338, %v463_v12  ;;  %v2325_v14 = vpop.f32.mrb[1].mxu0 }
 0x2e5   :  { %v370_v15 = vpop.f32.mrb[2].mxu1 }
 0x2e6   :  { %v470_v20 = vadd.f32 %v468_v13, %v3081_v11  ;;  %v467_v17 = vmul.f32 0.35355338, %v370_v15  ;;  %v2314_v16 = vpop.f32.mrb[3].mxu1 }
 0x2e8   :  { %v469_v21 = vadd.f32 %v467_v17, %v3084_v18  ;;  %v473_v23 = vmul.f32 1.442695, %v470_v20 }
 0x2ea   :  { %v471_v24 = vmul.f32 1.442695, %v469_v21  ;;  %v141_v21 = vld [vmem:[%s3410_s6 + $0x10] sm:$0xff] }
 0x2ec   :  { %2751 = vpow2.f32 %v471_v24 }
 0x2ed   :  { %2753 = vpow2.f32 %v473_v23  ;;  %v142_v23 = vld [vmem:[%s3410_s6 + $0x18] sm:$0xff] }
 0x2ee   :  { %v2563_v24 = vpack.c.bf16 %v142_v23, %v141_v21  ;;  %v871_v21 = vsub.s32 4, %v2945_v47 }
 0x2f0   :  { %v872_v23 = vrot.slane %v2955_v50, %v871_v21 }
 0x2f6   :  { %v2752_v30 = vpop.eup %2751 }
 0x2f7   :  { %v2754_v32 = vpop.eup %2753  ;;  %2334 = vmatprep.mubr.msk.f32.mxu1 %vm86_vm0, %v2752_v30 }
 0x2f8   :  { %2335 = vmatmul.mubr.msk.f32.vlgmr.msra.gmra.mrb[4].mxu1 %vm86_vm0, %v2754_v32 }
 0x2f9   :  { %2547 = vmatpush3.bf16.msra.mxu1 %v2546_v33  ;;  %2356 = vmatprep.mubr.msk.f32.mxu1 %vm2820_vm1, %v2821_v8 }
 0x2fa   :  { %2548 = vmatprep.subr.bf16.mxu1 %v2818_v53 }
 0x2fd   :  { %2550 = vmatpush3.bf16.msra.mxu1 %v2549_v36 }
 0x3cb   :  { %v2336_v41 = vpop.f32.mrb[4].mxu1 }
 0x3cc   :  { %2755 = vrcp.f32 %v2336_v41  ;;  %v547_v42 = vpop.f32.mrb[5].mxu1 }
 0x3cd   :  { %2757 = vrcp.f32 %v547_v42 }
 0x3d6   :  { %v2756_v54 = vpop.eup %2755 }
 0x3d7   :  { %v2758_v57 = vpop.eup %2757  ;;  %v559_v58 = vmul.f32 %v2756_v54, %v2754_v32  ;;  %v865_v54 = vsub.s32 3, %v2945_v47 }
 0x3d8   :  { %v558_v60 = vmul.f32 %v2758_v57, %v2752_v30 }
 0x3d9   :  { %2357 = vmatmul.mubr.msk.f32.vlgmr.msra.gmra.mrb[6].mxu1 %vm86_vm0, %v559_v58  ;;  %v860_v58 = vrot.slane %v2955_v50, %v859_v46 }
 0x3da   :  { %2346 = vmatmul.mubr.msk.f32.vlgmr.msra.gmra.mrb[2].mxu0 %vm86_vm0, %v558_v60 }
 0x3db   :  { %2554 = vmatpush3.bf16.msra.mxu0 %v2551_v40 }
 0x3dc   :  { %2556 = vmatprep.subr.bf16.mxu0 %v2555_v61 }
 0x3df   :  { %2558 = vmatpush3.bf16.msra.mxu0 %v2555_v61 }
 0x4ac   :  { %v734_v62 = vpop.f32.mrb[6].mxu1 }
 0x4ad   :  { %v645_v63 = vpop.f32.mrb[2].mxu0  ;;  %v2358_v0 = vpop.f32.mrb[7].mxu1 }
 0x4ae   :  { %v2347_v1 = vpop.f32.mrb[3].mxu0  ;;  %2367 = vmatprep.mubr.msk.f32.mxu0 %vm86_vm0, %v645_v63 }
 0x4af   :  { %2368 = vmatmul.mubr.msk.f32.vlgmr.msra.gmra.mrb[4].mxu0 %vm86_vm0, %v734_v62  ;;  %v866_v62 = vrot.slane %v2955_v50, %v865_v54 }
 0x582   :  { %v2369_v4 = vpop.f32.mrb[4].mxu0 }
 0x583   :  { %v820_v5 = vadd.f32 %v2369_v4, %v741_v3  ;;  %v814_v6 = vpop.f32.mrb[5].mxu0 }
 0x584   :  { %v815_v7 = vadd.f32 %v814_v6, %v741_v3 }
 0x585   :  { %v824_v9 = vadd.f32 %v820_v5, %v2941_v45  ;;  %v139_v45 = vld [vmem:[%s3410_s6] sm:$0xff] }
 0x586   :  { %v823_v10 = vadd.f32 %v815_v7, %v2937_v43  ;;  %v140_v43 = vld [vmem:[%s3410_s6 + $0x8] sm:$0xff]  ;;  %v143_v7 = vld [vmem:[%s3411_s7] sm:$0xff] }
 0x587   :  { %v828_v12 = vsel %vm86_vm0, %v824_v9, 0.0  ;;  %v834_v20 = vmul.f32 %v824_v9, %v824_v9  ;;  %v2559_v16 = vpack.c.bf16 %v140_v43, %v139_v45  ;;  %v149_v45 = vld [vmem:[%s3411_s7 + $0x30] sm:$0xff]  ;;  %v150_v43 = vld [vmem:[%s3411_s7 + $0x38] sm:$0xff] }
 0x588   :  { %829 = vadd.xlane.f32.xlu1 %v828_v12  ;;  %v825_v13 = vsel %vm86_vm0, %v823_v10, 0.0  ;;  %v833_v14 = vmul.f32 %v823_v10, %v823_v10  ;;  %v145_v12 = vld [vmem:[%s3411_s7 + $0x10] sm:$0xff] }
 0x589   :  { %826 = vadd.xlane.f32.xlu0 %v825_v13  ;;  %v838_v17 = vsel %vm86_vm0, %v834_v20, 0.0  ;;  %2560 = vmatprep.subr.bf16.mxu1 %v2559_v16  ;;  %v146_v13 = vld [vmem:[%s3411_s7 + $0x18] sm:$0xff]  ;;  %v148_v20 = vld [vmem:[%s3411_s7 + $0x28] sm:$0xff] }
 0x58a   :  { %v835_v15 = vsel %vm86_vm0, %v833_v14, 0.0  ;;  %2562 = vmatpush3.bf16.msra.mxu1 %v2559_v16  ;;  %v2571_v14 = vpack.c.bf16 %v146_v13, %v145_v12  ;;  %v2579_v16 = vpack.c.bf16 %v150_v43, %v149_v45  ;;  %v2144_v43 = vld [vmem:[%s3408_s4 + $0x30] sm:$0xff] }
 0x58b   :  { %2564 = vmatprep.subr.bf16.mxu1 %v2563_v24 }
 0x58d   :  { %836 = vadd.xlane.f32.xlu0 %v835_v15  ;;  %v147_v15 = vld [vmem:[%s3411_s7 + $0x20] sm:$0xff] }
 0x58e   :  { %2566 = vmatpush3.bf16.msra.mxu1 %v2563_v24 }
 0x591   :  { %839 = vadd.xlane.f32.xlu0 %v838_v17  ;;  %v2575_v17 = vpack.c.bf16 %v148_v20, %v147_v15 }
 0x615   :  { %v830_v28 = vpop.xlane.xlu1 %829 }
 0x616   :  { %v827_v25 = vpop.xlane.xlu0 %826  ;;  %v832_v30 = vmul.f32 0.03125, %v830_v28 }
 0x617   :  { %v831_v26 = vmul.f32 0.03125, %v827_v25 }
 0x618   :  { %v844_v36 = vmul.f32 %v832_v30, %v832_v30  ;;  %v850_v63 = vsub.f32 %v824_v9, %v832_v30  ;;  %v144_v9 = vld [vmem:[%s3411_s7 + $0x8] sm:$0xff] }
 0x619   :  { %v843_v32 = vmul.f32 %v831_v26, %v831_v26  ;;  %v849_v57 = vsub.f32 %v823_v10, %v831_v26  ;;  %v2567_v10 = vpack.c.bf16 %v144_v9, %v143_v7 }
 0x61a   :  { %v837_v29 = vpop.xlane.xlu0 %836 }
 0x61b   :  { %v841_v33 = vmul.f32 0.03125, %v837_v29  ;;  %2568 = vmatprep.subr.bf16.mxu0 %v2567_v10 }
 0x61c   :  { %2570 = vmatpush3.bf16.msra.mxu0 %v2567_v10 }
 0x61d   :  { %v845_v34 = vsub.f32 %v841_v33, %v843_v32  ;;  %2572 = vmatprep.subr.bf16.mxu0 %v2571_v14 }
 0x61e   :  { %v840_v35 = vpop.xlane.xlu0 %839 }
 0x61f   :  { %v847_v38 = vmax.f32 %v845_v34, 0.0  ;;  %v842_v39 = vmul.f32 0.03125, %v840_v35 }
 0x620   :  { %2574 = vmatpush3.bf16.msra.mxu0 %v2571_v14 }
 0x621   :  { %v851_v40 = vadd.f32 1e-12, %v847_v38  ;;  %v846_v41 = vsub.f32 %v842_v39, %v844_v36  ;;  %2576 = vmatprep.subr.bf16.mxu0 %v2575_v17 }
 0x623   :  { %2759 = vrsqrt.f32 %v851_v40  ;;  %v848_v42 = vmax.f32 %v846_v41, 0.0 }
 0x624   :  { %2578 = vmatpush3.bf16.msra.mxu0 %v2575_v17 }
 0x625   :  { %v852_v44 = vadd.f32 1e-12, %v848_v42  ;;  %2580 = vmatprep.subr.bf16.mxu0 %v2579_v16 }
 0x627   :  { %2761 = vrsqrt.f32 %v852_v44 }
 0x628   :  { %2582 = vmatpush3.bf16.msra.mxu0 %v2579_v16  ;;  %v2145_v16 = vld [vmem:[%s3408_s4 + $0x38] sm:$0xff] }
 0x629   :  { %2599 = vmatprep.subr.bf16.mxu0 %v2818_v53 }
 0x62d   :  { %v2760_v60 = vpop.eup %2759 }
 0x62e   :  { %v855_v61 = vmul.f32 %v2760_v60, %v849_v57 }
 0x630   :  { %v861_v0 = vmul.f32 %v860_v58, %v855_v61 }
 0x631   :  { %v2762_v1 = vpop.eup %2761 }
 0x632   :  { %v856_v3 = vmul.f32 %v2762_v1, %v850_v63  ;;  %v3140_v4 = vadd.f32 %v866_v62, %v861_v0  ;;  %v974_v63 = vsub.s32 5, %v2945_v47 }
 0x634   :  { %v862_v5 = vmul.f32 %v860_v58, %v856_v3  ;;  %2378 = vmatprep.mubr.msk.f32.mxu1 %vm86_vm0, %v3140_v4  ;;  %v975_v0 = vrot.slane %v2955_v50, %v974_v63 }
 0x636   :  { %v868_v6 = vadd.f32 %v866_v62, %v862_v5 }
 0x638   :  { %2379 = vmatmul.mubr.msk.f32.vlgmr.msra.gmra.mrb[8].mxu1 %vm86_vm0, %v868_v6 }
 0x70b   :  { %v2380_v24 = vpop.f32.mrb[8].mxu1 }
 0x70c   :  { %v951_v25 = vadd.f32 %v2380_v24, %v872_v23  ;;  %v945_v26 = vpop.f32.mrb[9].mxu1 }
 0x70d   :  { %v946_v28 = vadd.f32 %v945_v26, %v872_v23  ;;  %v2587_v23 = vpack.c.bf16 %v2145_v16, %v2144_v43 }
 0x70e   :  { %v955_v29 = vmul.f32 %v951_v25, %v951_v25 }
 0x70f   :  { %v954_v30 = vmul.f32 %v946_v28, %v946_v28 }
 0x710   :  { %v957_v32 = vmul.f32 %v955_v29, %v951_v25 }
 0x711   :  { %v956_v33 = vmul.f32 %v954_v30, %v946_v28 }
 0x712   :  { %v959_v34 = vmul.f32 0.044715, %v957_v32 }
 0x713   :  { %v958_v35 = vmul.f32 0.044715, %v956_v33 }
 0x714   :  { %v961_v36 = vadd.f32 %v959_v34, %v951_v25 }
 0x715   :  { %v960_v38 = vadd.f32 %v958_v35, %v946_v28 }
 0x716   :  { %v963_v39 = vmul.f32 0.7978846, %v961_v36 }
 0x717   :  { %v962_v40 = vmul.f32 0.7978846, %v960_v38 }
 0x718   :  { %2763 = vtanh.f32 %v963_v39 }
 0x719   :  { %2765 = vtanh.f32 %v962_v40 }
 0x722   :  { %v2764_v41 = vpop.eup %2763 }
 0x723   :  { %v2766_v42 = vpop.eup %2765  ;;  %v967_v44 = vadd.f32 1.0, %v2764_v41 }
 0x724   :  { %v966_v57 = vadd.f32 1.0, %v2766_v42 }
 0x725   :  { %v969_v58 = vmul.f32 0.5, %v967_v44  ;;  %v1094_v44 = vsub.s32 6, %v2945_v47 }
 0x726   :  { %v968_v60 = vmul.f32 0.5, %v966_v57  ;;  %v1100_v57 = vsub.s32 7, %v2945_v47 }
 0x727   :  { %v971_v62 = vmul.f32 %v969_v58, %v951_v25 }
 0x728   :  { %v970_v61 = vmul.f32 %v968_v60, %v946_v28  ;;  %v1095_v60 = vrot.slane %v2955_v50, %v1094_v44 }
 0x72a   :  { %2397 = vmatprep.mubr.msk.f32.mxu0 %vm976_vm3, %v970_v61 }
 0x72b   :  { %2398 = vmatmul.mubr.msk.f32.vlgmr.msra.gmra.mrb[6].mxu0 %vm976_vm3, %v971_v62 }
 0x72c   :  { %2430 = vmatprep.mubr.msk.f32.mxu0 %vm2820_vm1, %v2821_v8 }
 0x7fe   :  { %v2399_v1 = vpop.f32.mrb[6].mxu0 }
 0x7ff   :  { %v1055_v3 = vadd.f32 %v2399_v1, %v975_v0  ;;  %v1049_v5 = vpop.f32.mrb[7].mxu0 }
 0x800   :  { %v1050_v7 = vadd.f32 %v1049_v5, %v975_v0  ;;  %v1101_v5 = vrot.slane %v2955_v50, %v1100_v57 }
 0x801   :  { %v1059_v9 = vadd.f32 %v1055_v3, %v868_v6  ;;  %v2142_v6 = vld [vmem:[%s3408_s4 + $0x20] sm:$0xff] }
 0x802   :  { %v1058_v10 = vadd.f32 %v1050_v7, %v3140_v4  ;;  %v2143_v4 = vld [vmem:[%s3408_s4 + $0x28] sm:$0xff] }
 0x803   :  { %v1063_v12 = vsel %vm86_vm0, %v1059_v9, 0.0  ;;  %v1069_v13 = vmul.f32 %v1059_v9, %v1059_v9  ;;  %v2583_v45 = vpack.c.bf16 %v2143_v4, %v2142_v6 }
 0x804   :  { %1064 = vadd.xlane.f32.xlu1 %v1063_v12  ;;  %v1060_v14 = vsel %vm86_vm0, %v1058_v10, 0.0  ;;  %v1068_v15 = vmul.f32 %v1058_v10, %v1058_v10 }
 0x805   :  { %1061 = vadd.xlane.f32.xlu0 %v1060_v14  ;;  %v1073_v20 = vsel %vm86_vm0, %v1069_v13, 0.0  ;;  %2584 = vmatprep.subr.bf16.mxu1 %v2583_v45 }
 0x806   :  { %v1070_v17 = vsel %vm86_vm0, %v1068_v15, 0.0  ;;  %2586 = vmatpush3.bf16.msra.mxu1 %v2583_v45 }
 0x807   :  { %2588 = vmatprep.subr.bf16.mxu1 %v2587_v23 }
 0x808   :  { %1074 = vadd.xlane.f32.xlu1 %v1073_v20 }
 0x809   :  { %1071 = vadd.xlane.f32.xlu0 %v1070_v17 }
 0x80a   :  { %2590 = vmatpush3.bf16.msra.mxu1 %v2587_v23 }
 0x80b   :  { %2591 = vmatprep.subr.bf16.mxu1 %v2818_v53 }
 0x891   :  { %v1065_v24 = vpop.xlane.xlu1 %1064 }
 0x892   :  { %v1067_v25 = vmul.f32 0.03125, %v1065_v24  ;;  %v1062_v26 = vpop.xlane.xlu0 %1061 }
 0x893   :  { %v1066_v28 = vmul.f32 0.03125, %v1062_v26 }
 0x894   :  { %v1079_v30 = vmul.f32 %v1067_v25, %v1067_v25  ;;  %v1085_v58 = vsub.f32 %v1059_v9, %v1067_v25  ;;  %v3221_v9 = vld [vmem:[%s3412_s8 + $0x8] sm:$0xff] }
 0x895   :  { %v1075_v29 = vpop.xlane.xlu1 %1074  ;;  %v1078_v34 = vmul.f32 %v1066_v28, %v1066_v28  ;;  %v1084_v62 = vsub.f32 %v1058_v10, %v1066_v28  ;;  %v1133_v50 = vrot.slane %v3221_v9, %v2950_v49 }
 0x896   :  { %v1077_v32 = vmul.f32 0.03125, %v1075_v29  ;;  %v1072_v33 = vpop.xlane.xlu0 %1071 }
 0x897   :  { %v1076_v35 = vmul.f32 0.03125, %v1072_v33 }
 0x898   :  { %v1081_v36 = vsub.f32 %v1077_v32, %v1079_v30 }
 0x899   :  { %v1080_v38 = vsub.f32 %v1076_v35, %v1078_v34 }
 0x89a   :  { %v1083_v39 = vmax.f32 %v1081_v36, 0.0 }
 0x89b   :  { %v1082_v40 = vmax.f32 %v1080_v38, 0.0 }
 0x89c   :  { %v1087_v41 = vadd.f32 1e-12, %v1083_v39 }
 0x89d   :  { %v1086_v42 = vadd.f32 1e-12, %v1082_v40 }
 0x89e   :  { %2767 = vrsqrt.f32 %v1087_v41 }
 0x89f   :  { %2769 = vrsqrt.f32 %v1086_v42 }
 0x8a8   :  { %v2768_v61 = vpop.eup %2767 }
 0x8a9   :  { %v2770_v0 = vpop.eup %2769  ;;  %v1091_v1 = vmul.f32 %v2768_v61, %v1085_v58 }
 0x8aa   :  { %v1090_v3 = vmul.f32 %v2770_v0, %v1084_v62 }
 0x8ab   :  { %v1097_v7 = vmul.f32 %v1095_v60, %v1091_v1 }
 0x8ac   :  { %v1096_v12 = vmul.f32 %v1095_v60, %v1090_v3 }
 0x8ad   :  { %v3210_v14 = vadd.f32 %v1101_v5, %v1097_v7 }
 0x8ae   :  { %v3208_v13 = vadd.f32 %v1101_v5, %v1096_v12 }
 0x8b0   :  { %2408 = vmatprep.mubr.msk.f32.mxu1 %vm86_vm0, %v3208_v13 }
 0x8b1   :  { %2409 = vmatmul.mubr.msk.f32.vlgmr.msra.gmra.mrb[10].mxu1 %vm86_vm0, %v3210_v14 }
 0x8b2   :  { %2419 = vmatprep.mubr.msk.f32.mxu1 %vm2820_vm1, %v2821_v8 }
 0x984   :  { %v2410_v10 = vpop.f32.mrb[10].mxu1 }
 0x985   :  { %v3225_v15 = vadd.f32 %v2410_v10, %v1133_v50  ;;  %v1206_v20 = vpop.f32.mrb[11].mxu1 }
 0x986   :  { %v3227_v17 = vadd.f32 %v1206_v20, %v1133_v50 }
 0x987   :  { %v1219_v6 = vmul.f32 %v3225_v15, %v2963_v55  ;;  %v1220_v4 = vmul.f32 %v3225_v15, %v2947_v48  ;;  %v1222_v29 = vmul.f32 %v3225_v15, %v2969_v59  ;;  %v1227_v35 = vmul.f32 %v3225_v15, %v3021_v27 }
 0x988   :  { %v1215_v45 = vmul.f32 %v3227_v17, %v2963_v55  ;;  %v1216_v43 = vmul.f32 %v3227_v17, %v2947_v48  ;;  %v1217_v23 = vmul.f32 %v3227_v17, %v2957_v51  ;;  %v1218_v24 = vmul.f32 %v3227_v17, %v2969_v59 }
 0x989   :  { %v2712_v16 = vpack.i.bf16 %v1220_v4, %v1219_v6  ;;  %v1223_v26 = vmul.f32 %v3227_v17, %v3021_v27  ;;  %v1224_v28 = vmul.f32 %v3227_v17, %v3015_v22  ;;  %v1221_v48 = vmul.f32 %v3225_v15, %v2957_v51 }
 0x98a   :  { %v2707_v25 = vpack.i.bf16 %v1216_v43, %v1215_v45  ;;  %v2717_v55 = vpack.i.bf16 %v1218_v24, %v1217_v23  ;;  %v1225_v32 = vmul.f32 %v3227_v17, %v3035_v37  ;;  %v1226_v33 = vmul.f32 %v3227_v17, %v3027_v31 }
 0x98b   :  { %2713 = vrot.lane.b32.xlu1 %v2712_v16, %s2819_s22  ;;  %v2732_v30 = vpack.i.bf16 %v1224_v28, %v1223_v26  ;;  %v2722_v34 = vpack.i.bf16 %v1222_v29, %v1221_v48  ;;  %v1228_v51 = vmul.f32 %v3225_v15, %v3015_v22  ;;  %v1229_v38 = vmul.f32 %v3225_v15, %v3035_v37 }
 0x98c   :  { %2708 = vrot.lane.b32.xlu0 %v2707_v25, %s2819_s22  ;;  %v2737_v36 = vpack.i.bf16 %v1226_v33, %v1225_v32  ;;  %v1230_v39 = vmul.f32 %v3225_v15, %v3027_v31 }
 0x98d   :  { %v2727_v59 = vpack.i.bf16 %v1228_v51, %v1227_v35 }
 0x98e   :  { %v2742_v40 = vpack.i.bf16 %v1230_v39, %v1229_v38 }
 0x98f   :  { %2718 = vrot.lane.b32.xlu1 %v2717_v55, %s2819_s22 }
 0x990   :  { %2733 = vrot.lane.b32.xlu0 %v2732_v30, %s2822_s0 }
 0x993   :  { %2723 = vrot.lane.b32.xlu1 %v2722_v34, %s2819_s22 }
 0x994   :  { %2738 = vrot.lane.b32.xlu0 %v2737_v36, %s2822_s0  ;;  %v2147_v36 = vld [vmem:[%s3409_s5 + $0x28] sm:$0xff] }
 0x997   :  { %2728 = vrot.lane.b32.xlu1 %v2727_v59, %s2822_s0 }
 0x99b   :  { %2743 = vrot.lane.b32.xlu1 %v2742_v40, %s2822_s0 }
 0x9fd   :  { %v2714_v27 = vpop.permute.xlu1 %2713 }
 0x9fe   :  { %v2716_v41 = vunpack.i.h.bf16 %v2714_v27  ;;  %v2715_v22 = vunpack.i.l.bf16 %v2714_v27  ;;  %v2709_v42 = vpop.permute.xlu0 %2708 }
 0x9ff   :  { %v2711_v58 = vunpack.i.h.bf16 %v2709_v42  ;;  %v2710_v60 = vunpack.i.l.bf16 %v2709_v42 }
 0xa00   :  { %v2600_v61 = vpack.c.bf16 %v2716_v41, %v2715_v22 }
 0xa01   :  { %v2592_v62 = vpack.c.bf16 %v2711_v58, %v2710_v60  ;;  %v2719_v0 = vpop.permute.xlu1 %2718 }
 0xa02   :  { %2602 = vmatpush3.bf16.xpose.msk.msra.mxu0 %vm3005_vm2, %v2600_v61  ;;  %v2721_v31 = vunpack.i.h.bf16 %v2719_v0  ;;  %v2720_v37 = vunpack.i.l.bf16 %v2719_v0  ;;  %v2734_v7 = vpop.permute.xlu0 %2733  ;;  %v1691_v0 = vrot.slane %v3221_v9, %v3110_v2 }
 0xa03   :  { %2594 = vmatpush3.bf16.xpose.msk.msra.mxu1 %vm3005_vm2, %v2592_v62  ;;  %2603 = vmatprep.subr.bf16.mxu0 %v2818_v53  ;;  %v2736_v10 = vunpack.i.h.bf16 %v2734_v7  ;;  %v2735_v20 = vunpack.i.l.bf16 %v2734_v7 }
 0xa04   :  { %2595 = vmatprep.subr.bf16.mxu1 %v2818_v53  ;;  %v2596_v50 = vpack.c.bf16 %v2721_v31, %v2720_v37 }
 0xa05   :  { %v2724_v1 = vpop.permute.xlu1 %2723  ;;  %v2616_v4 = vpack.c.bf16 %v2736_v10, %v2735_v20 }
 0xa06   :  { %v2726_v3 = vunpack.i.h.bf16 %v2724_v1  ;;  %v2725_v5 = vunpack.i.l.bf16 %v2724_v1  ;;  %v2739_v6 = vpop.permute.xlu0 %2738 }
 0xa07   :  { %v2741_v45 = vunpack.i.h.bf16 %v2739_v6  ;;  %v2740_v43 = vunpack.i.l.bf16 %v2739_v6 }
 0xa08   :  { %v2604_v12 = vpack.c.bf16 %v2726_v3, %v2725_v5 }
 0xa09   :  { %v2619_v19 = vpack.c.bf16 %v2741_v45, %v2740_v43  ;;  %v2729_v48 = vpop.permute.xlu1 %2728  ;;  %v2152_v45 = vld [vmem:[%s3410_s6 + $0x30] sm:$0xff] }
 0xa0a   :  { %2606 = vmatpush3.bf16.xpose.msk.msra.mxu0 %vm3005_vm2, %v2604_v12  ;;  %v2731_v29 = vunpack.i.h.bf16 %v2729_v48  ;;  %v2730_v30 = vunpack.i.l.bf16 %v2729_v48 }
 0xa0b   :  { %2598 = vmatpush3.bf16.xpose.msk.msra.mxu1 %vm3005_vm2, %v2596_v50  ;;  %2615 = vmatprep.subr.bf16.mxu0 %v2818_v53 }
 0xa0c   :  { %2608 = vmatprep.subr.bf16.mxu1 %v3063_v52  ;;  %v2622_v34 = vpack.c.bf16 %v2731_v29, %v2730_v30 }
 0xa11   :  { %2431 = vmatmul.mubr.msk.f32.vlgmr.msra.gmra.mrb[8].mxu0 %vm86_vm0, %v3225_v15 }
 0xa12   :  { %2420 = vmatmul.mubr.msk.f32.vlgmr.msra.gmra.mrb[12].mxu1 %vm86_vm0, %v3227_v17  ;;  %2617 = vmatpush3.bf16.msra.mxu0 %v2616_v4 }
 0xa13   :  { %2618 = vmatprep.subr.bf16.mxu0 %v2818_v53  ;;  %2610 = vmatpush3.bf16.msra.mxu1 %v3063_v52 }
 0xa14   :  { %2612 = vmatprep.subr.bf16.mxu1 %v3068_v56  ;;  %2452 = vmatprep.mubr.msk.f32.mxu0 %vm2820_vm1, %v2821_v8 }
 0xa16   :  { %2620 = vmatpush3.bf16.msra.mxu0 %v2619_v19  ;;  %v2153_v19 = vld [vmem:[%s3410_s6 + $0x38] sm:$0xff] }
 0xa17   :  { %2614 = vmatpush3.bf16.msra.mxu1 %v3068_v56  ;;  %v2744_v56 = vpop.permute.xlu1 %2743 }
 0xa18   :  { %2621 = vmatprep.subr.bf16.mxu1 %v2818_v53  ;;  %v2746_v35 = vunpack.i.h.bf16 %v2744_v56  ;;  %v2745_v51 = vunpack.i.l.bf16 %v2744_v56 }
 0xae4   :  { %v1413_v15 = vpop.f32.mrb[8].mxu0 }
 0xae5   :  { %v1418_v16 = vmul.f32 0.35355338, %v1413_v15  ;;  %v1320_v23 = vpop.f32.mrb[12].mxu1  ;;  %v2432_v17 = vpop.f32.mrb[9].mxu0  ;;  %v2639_v15 = vpack.c.bf16 %v2153_v19, %v2152_v45 }
 0xae6   :  { %v1417_v24 = vmul.f32 0.35355338, %v1320_v23  ;;  %v2421_v25 = vpop.f32.mrb[13].mxu1 }
 0xae7   :  { %v1420_v26 = vadd.f32 %v1418_v16, %v3081_v11  ;;  %v2625_v11 = vpack.c.bf16 %v2746_v35, %v2745_v51  ;;  %v1810_v51 = vrot.slane %v3221_v9, %v859_v46  ;;  %v2154_v46 = vld [vmem:[%s3411_s7 + $0x40] sm:$0xff] }
 0xae8   :  { %v1419_v52 = vadd.f32 %v1417_v24, %v3084_v18  ;;  %v2146_v18 = vld [vmem:[%s3409_s5 + $0x20] sm:$0xff] }
 0xae9   :  { %v1423_v28 = vmul.f32 1.442695, %v1420_v26  ;;  %v2627_v59 = vpack.c.bf16 %v2147_v36, %v2146_v18  ;;  %v1816_v36 = vrot.slane %v3221_v9, %v865_v54 }
 0xaea   :  { %v1421_v55 = vmul.f32 1.442695, %v1419_v52 }
 0xaeb   :  { %2628 = vmatprep.subr.bf16.mxu0 %v2627_v59 }
 0xaec   :  { %2771 = vpow2.f32 %v1421_v55 }
 0xaed   :  { %2773 = vpow2.f32 %v1423_v28 }
 0xaf6   :  { %v2772_v32 = vpop.eup %2771 }
 0xaf7   :  { %v2774_v33 = vpop.eup %2773  ;;  %2441 = vmatprep.mubr.msk.f32.mxu1 %vm86_vm0, %v2772_v32 }
 0xaf8   :  { %2442 = vmatmul.mubr.msk.f32.vlgmr.msra.gmra.mrb[14].mxu1 %vm86_vm0, %v2774_v33 }
 0xaf9   :  { %2623 = vmatpush3.bf16.msra.mxu1 %v2622_v34  ;;  %2463 = vmatprep.mubr.msk.f32.mxu1 %vm2820_vm1, %v2821_v8  ;;  %v2149_v8 = vld [vmem:[%s3409_s5 + $0x38] sm:$0xff] }
 0xafa   :  { %2624 = vmatprep.subr.bf16.mxu1 %v2818_v53  ;;  %v2148_v53 = vld [vmem:[%s3409_s5 + $0x30] sm:$0xff] }
 0xafb   :  { %v2631_v42 = vpack.c.bf16 %v2149_v8, %v2148_v53 }
 0xafd   :  { %2626 = vmatpush3.bf16.msra.mxu1 %v2625_v11 }
 0xbcb   :  { %v2443_v38 = vpop.f32.mrb[14].mxu1 }
 0xbcc   :  { %2775 = vrcp.f32 %v2443_v38  ;;  %v1497_v39 = vpop.f32.mrb[15].mxu1 }
 0xbcd   :  { %2777 = vrcp.f32 %v1497_v39 }
 0xbd6   :  { %v2776_v40 = vpop.eup %2775 }
 0xbd7   :  { %v2778_v27 = vpop.eup %2777  ;;  %v1509_v41 = vmul.f32 %v2776_v40, %v2774_v33 }
 0xbd8   :  { %v1508_v22 = vmul.f32 %v2778_v27, %v2772_v32 }
 0xbd9   :  { %2464 = vmatmul.mubr.msk.f32.vlgmr.msra.gmra.mrb[16].mxu1 %vm86_vm0, %v1509_v41  ;;  %v2155_v41 = vld [vmem:[%s3411_s7 + $0x48] sm:$0xff] }
 0xbda   :  { %2453 = vmatmul.mubr.msk.f32.vlgmr.msra.gmra.mrb[10].mxu0 %vm86_vm0, %v1508_v22  ;;  %v2643_v54 = vpack.c.bf16 %v2155_v41, %v2154_v46  ;;  %v2156_v22 = vld [vmem:[%s3411_s7 + $0x50] sm:$0xff] }
 0xbdb   :  { %2630 = vmatpush3.bf16.msra.mxu0 %v2627_v59 }
 0xbdc   :  { %2632 = vmatprep.subr.bf16.mxu0 %v2631_v42 }
 0xbdf   :  { %2634 = vmatpush3.bf16.msra.mxu0 %v2631_v42  ;;  %v2157_v42 = vld [vmem:[%s3411_s7 + $0x58] sm:$0xff] }
 0xbe0   :  { %2644 = vmatprep.subr.bf16.mxu0 %v2643_v54 }
 0xcac   :  { %v1684_v58 = vpop.f32.mrb[16].mxu1 }
 0xcad   :  { %v1595_v60 = vpop.f32.mrb[10].mxu0  ;;  %v2465_v61 = vpop.f32.mrb[17].mxu1 }
 0xcae   :  { %v2454_v62 = vpop.f32.mrb[11].mxu0  ;;  %2474 = vmatprep.mubr.msk.f32.mxu0 %vm86_vm0, %v1595_v60  ;;  %v2158_v60 = vld [vmem:[%s3411_s7 + $0x60] sm:$0xff]  ;;  %v2159_v61 = vld [vmem:[%s3411_s7 + $0x68] sm:$0xff] }
 0xcaf   :  { %2475 = vmatmul.mubr.msk.f32.vlgmr.msra.gmra.mrb[12].mxu0 %vm86_vm0, %v1684_v58  ;;  %v2647_v58 = vpack.c.bf16 %v2157_v42, %v2156_v22  ;;  %v2651_v62 = vpack.c.bf16 %v2159_v61, %v2158_v60 }
 0xcb0   :  { %2646 = vmatpush3.bf16.msra.mxu0 %v2643_v54 }
 0xcb1   :  { %2648 = vmatprep.subr.bf16.mxu0 %v2647_v58 }
 0xcb4   :  { %2650 = vmatpush3.bf16.msra.mxu0 %v2647_v58 }
 0xcb5   :  { %2652 = vmatprep.subr.bf16.mxu0 %v2651_v62 }
 0xcb8   :  { %2654 = vmatpush3.bf16.msra.mxu0 %v2651_v62 }
 0xd82   :  { %v2476_v31 = vpop.f32.mrb[12].mxu0 }
 0xd83   :  { %v1770_v37 = vadd.f32 %v2476_v31, %v1691_v0  ;;  %v1764_v1 = vpop.f32.mrb[13].mxu0  ;;  %v2161_v31 = vld [vmem:[%s3411_s7 + $0x78] sm:$0xff] }
 0xd84   :  { %v1765_v3 = vadd.f32 %v1764_v1, %v1691_v0  ;;  %v2160_v0 = vld [vmem:[%s3411_s7 + $0x70] sm:$0xff]  ;;  %v1822_v1 = vrot.slane %v3221_v9, %v871_v21 }
 0xd85   :  { %v1774_v5 = vadd.f32 %v1770_v37, %v3210_v14  ;;  %v2150_v14 = vld [vmem:[%s3410_s6 + $0x20] sm:$0xff]  ;;  %v2655_v37 = vpack.c.bf16 %v2161_v31, %v2160_v0  ;;  %v2044_v31 = vrot.slane %v3221_v9, %v1094_v44 }
 0xd86   :  { %v1773_v7 = vadd.f32 %v1765_v3, %v3208_v13  ;;  %v2151_v13 = vld [vmem:[%s3410_s6 + $0x28] sm:$0xff] }
 0xd87   :  { %v1778_v12 = vsel %vm86_vm0, %v1774_v5, 0.0  ;;  %v1784_v6 = vmul.f32 %v1774_v5, %v1774_v5  ;;  %v2635_v43 = vpack.c.bf16 %v2151_v13, %v2150_v14  ;;  %2656 = vmatprep.subr.bf16.mxu0 %v2655_v37 }
 0xd88   :  { %1779 = vadd.xlane.f32.xlu1 %v1778_v12  ;;  %v1775_v50 = vsel %vm86_vm0, %v1773_v7, 0.0  ;;  %v1783_v10 = vmul.f32 %v1773_v7, %v1773_v7  ;;  %2658 = vmatpush3.bf16.msra.mxu0 %v2655_v37 }
 0xd89   :  { %1776 = vadd.xlane.f32.xlu0 %v1775_v50  ;;  %v1788_v4 = vsel %vm86_vm0, %v1784_v6, 0.0  ;;  %2636 = vmatprep.subr.bf16.mxu1 %v2635_v43 }
 0xd8a   :  { %v1785_v20 = vsel %vm86_vm0, %v1783_v10, 0.0  ;;  %2638 = vmatpush3.bf16.msra.mxu1 %v2635_v43 }
 0xd8b   :  { %2640 = vmatprep.subr.bf16.mxu1 %v2639_v15 }
 0xd8d   :  { %1786 = vadd.xlane.f32.xlu0 %v1785_v20 }
 0xd8e   :  { %2642 = vmatpush3.bf16.msra.mxu1 %v2639_v15 }
 0xd91   :  { %1789 = vadd.xlane.f32.xlu0 %v1788_v4 }
 0xe15   :  { %v1780_v17 = vpop.xlane.xlu1 %1779 }
 0xe16   :  { %v1777_v16 = vpop.xlane.xlu0 %1776  ;;  %v1782_v25 = vmul.f32 0.03125, %v1780_v17 }
 0xe17   :  { %v1781_v23 = vmul.f32 0.03125, %v1777_v16 }
 0xe18   :  { %v1794_v48 = vmul.f32 %v1782_v25, %v1782_v25  ;;  %v1800_v59 = vsub.f32 %v1774_v5, %v1782_v25 }
 0xe19   :  { %v1793_v26 = vmul.f32 %v1781_v23, %v1781_v23  ;;  %v1799_v35 = vsub.f32 %v1773_v7, %v1781_v23 }
 0xe1a   :  { %v1787_v24 = vpop.xlane.xlu0 %1786 }
 0xe1b   :  { %v1791_v52 = vmul.f32 0.03125, %v1787_v24 }
 0xe1d   :  { %v1795_v28 = vsub.f32 %v1791_v52, %v1793_v26  ;;  %v1925_v52 = vrot.slane %v3221_v9, %v974_v63 }
 0xe1e   :  { %v1790_v55 = vpop.xlane.xlu0 %1789 }
 0xe1f   :  { %v1797_v29 = vmax.f32 %v1795_v28, 0.0  ;;  %v1792_v30 = vmul.f32 0.03125, %v1790_v55 }
 0xe21   :  { %v1801_v56 = vadd.f32 1e-12, %v1797_v29  ;;  %v1796_v32 = vsub.f32 %v1792_v30, %v1794_v48 }
 0xe23   :  { %2779 = vrsqrt.f32 %v1801_v56  ;;  %v1798_v33 = vmax.f32 %v1796_v32, 0.0 }
 0xe25   :  { %v1802_v34 = vadd.f32 1e-12, %v1798_v33 }
 0xe27   :  { %2781 = vrsqrt.f32 %v1802_v34 }
 0xe2d   :  { %v2780_v11 = vpop.eup %2779 }
 0xe2e   :  { %v1805_v18 = vmul.f32 %v2780_v11, %v1799_v35 }
 0xe30   :  { %v1811_v38 = vmul.f32 %v1810_v51, %v1805_v18 }
 0xe31   :  { %v2782_v39 = vpop.eup %2781 }
 0xe32   :  { %v1806_v53 = vmul.f32 %v2782_v39, %v1800_v59  ;;  %v1817_v8 = vadd.f32 %v1816_v36, %v1811_v38 }
 0xe34   :  { %v1812_v40 = vmul.f32 %v1810_v51, %v1806_v53  ;;  %2485 = vmatprep.mubr.msk.f32.mxu1 %vm86_vm0, %v1817_v8  ;;  %v41_v51 = vld [vmem:[%s3405_s1] sm:$0x3]  ;;  %s2824_s1 = smov [#allocation2]  }
 0xe35   :  { %v2084_v18 = vsel %vm2083_vm4, %v41_v51, 0.0  ;;  %v2056_v59 = vrot.slane %v41_v51, %v2950_v49  ;;  %s2109_s12 = sshll.u32 %s2824_s1, 4  ;;  %s2110_s12 = int_to_ptr.vmem [resolvable:$true] %s2109_s12 }
 0xe36   :  { %v1818_v27 = vadd.f32 %v1816_v36, %v1812_v40  ;;  %v2063_v36 = vrot.slane %v41_v51, %v3110_v2  ;;  %s2793_s2 = scalar_lea.vmem %s2110_s12, 32  ;;  %p2798_p1 = scmp.lt.s32.totalorder %s2110_s12, %s2110_s12 }
 0xe37   :  { %p2794_p0 = scmp.ne.s32.totalorder %s2110_s12, %s2793_s2  ;;  %p2799_p2 = scmp.lt.s32.totalorder %s2793_s2, %s2793_s2 }
 0xe38   :  { %2486 = vmatmul.mubr.msk.f32.vlgmr.msra.gmra.mrb[18].mxu1 %vm86_vm0, %v1818_v27 }
 0xe39   :  { %p2800_p3 = por %p2799_p2, %p2798_p1 }
 0xe3b   :  { %p2801_p4 = pnand %p2800_p3, %p2794_p0 }
 0xf0b   :  { %v2487_v3 = vpop.f32.mrb[18].mxu1 }
 0xf0c   :  { %v1901_v5 = vadd.f32 %v2487_v3, %v1822_v1  ;;  %v1895_v7 = vpop.f32.mrb[19].mxu1 }
 0xf0d   :  { %v1896_v12 = vadd.f32 %v1895_v7, %v1822_v1  ;;  %v2050_v7 = vrot.slane %v3221_v9, %v1100_v57 }
 0xf0e   :  { %v1905_v50 = vmul.f32 %v1901_v5, %v1901_v5 }
 0xf0f   :  { %v1904_v10 = vmul.f32 %v1896_v12, %v1896_v12 }
 0xf10   :  { %v1907_v20 = vmul.f32 %v1905_v50, %v1901_v5 }
 0xf11   :  { %v1906_v6 = vmul.f32 %v1904_v10, %v1896_v12 }
 0xf12   :  { %v1909_v4 = vmul.f32 0.044715, %v1907_v20 }
 0xf13   :  { %v1908_v14 = vmul.f32 0.044715, %v1906_v6 }
 0xf14   :  { %v1911_v13 = vadd.f32 %v1909_v4, %v1901_v5 }
 0xf15   :  { %v1910_v45 = vadd.f32 %v1908_v14, %v1896_v12 }
 0xf16   :  { %v1913_v43 = vmul.f32 0.7978846, %v1911_v13 }
 0xf17   :  { %v1912_v19 = vmul.f32 0.7978846, %v1910_v45 }
 0xf18   :  { %2783 = vtanh.f32 %v1913_v43 }
 0xf19   :  { %2785 = vtanh.f32 %v1912_v19 }
 0xf22   :  { %v2784_v15 = vpop.eup %2783 }
 0xf23   :  { %v2786_v16 = vpop.eup %2785  ;;  %v1917_v23 = vadd.f32 1.0, %v2784_v15 }
 0xf24   :  { %v1916_v21 = vadd.f32 1.0, %v2786_v16 }
 0xf25   :  { %v1919_v17 = vmul.f32 0.5, %v1917_v23 }
 0xf26   :  { %v1918_v24 = vmul.f32 0.5, %v1916_v21 }
 0xf27   :  { %v1921_v26 = vmul.f32 %v1919_v17, %v1901_v5 }
 0xf28   :  { %v1920_v25 = vmul.f32 %v1918_v24, %v1896_v12 }
 0xf2a   :  { %2504 = vmatprep.mubr.msk.f32.mxu0 %vm976_vm3, %v1920_v25 }
 0xf2b   :  { %2505 = vmatmul.mubr.msk.f32.vlgmr.msra.gmra.mrb[14].mxu0 %vm976_vm3, %v1921_v26 }
 0xffe   :  { %v2506_v28 = vpop.f32.mrb[14].mxu0 }
 0xfff   :  { %v2004_v55 = vadd.f32 %v2506_v28, %v1925_v52  ;;  %v1998_v48 = vpop.f32.mrb[15].mxu0 }
0x1000   :  { %v1999_v29 = vadd.f32 %v1998_v48, %v1925_v52 }
0x1001   :  { %v2008_v30 = vadd.f32 %v2004_v55, %v1818_v27 }
0x1002   :  { %v2007_v56 = vadd.f32 %v1999_v29, %v1817_v8 }
0x1003   :  { %v2012_v32 = vsel %vm86_vm0, %v2008_v30, 0.0  ;;  %v2018_v33 = vmul.f32 %v2008_v30, %v2008_v30 }
0x1004   :  { %2013 = vadd.xlane.f32.xlu0 %v2012_v32  ;;  %v2009_v34 = vsel %vm86_vm0, %v2007_v56, 0.0  ;;  %v2017_v35 = vmul.f32 %v2007_v56, %v2007_v56 }
0x1005   :  { %2010 = vadd.xlane.f32.xlu1 %v2009_v34  ;;  %v2022_v63 = vsel %vm86_vm0, %v2018_v33, 0.0 }
0x1006   :  { %v2019_v11 = vsel %vm86_vm0, %v2017_v35, 0.0 }
0x1008   :  { %2023 = vadd.xlane.f32.xlu0 %v2022_v63 }
0x1009   :  { %2020 = vadd.xlane.f32.xlu1 %v2019_v11 }
0x100c   :  { %2085 = vadd.xlane.f32.xlu0 %v2084_v18 }
0x101a   :  { %2065 = vbcast.lane.b32.xlu1 %v2063_v36, 256 }
0x1022   :  { %2058 = vbcast.lane.b32.xlu0 %v2056_v59, 256 }
0x1091   :  { %v2014_v38 = vpop.xlane.xlu0 %2013 }
0x1092   :  { %v2016_v39 = vmul.f32 0.03125, %v2014_v38  ;;  %v2011_v53 = vpop.xlane.xlu1 %2010 }
0x1093   :  { %v2015_v8 = vmul.f32 0.03125, %v2011_v53 }
0x1094   :  { %v2028_v27 = vmul.f32 %v2016_v39, %v2016_v39  ;;  %v2034_v49 = vsub.f32 %v2008_v30, %v2016_v39 }
0x1095   :  { %v2024_v40 = vpop.xlane.xlu0 %2023  ;;  %v2027_v54 = vmul.f32 %v2015_v8, %v2015_v8  ;;  %v2033_v1 = vsub.f32 %v2007_v56, %v2015_v8 }
0x1096   :  { %v2026_v46 = vmul.f32 0.03125, %v2024_v40  ;;  %v2021_v41 = vpop.xlane.xlu1 %2020 }
0x1097   :  { %v2025_v22 = vmul.f32 0.03125, %v2021_v41 }
0x1098   :  { %v2030_v42 = vsub.f32 %v2026_v46, %v2028_v27 }
0x1099   :  { %v2029_v58 = vsub.f32 %v2025_v22, %v2027_v54  ;;  %v2086_v0 = vpop.xlane.xlu0 %2085 }
0x109a   :  { %v2032_v60 = vmax.f32 %v2030_v42, 0.0  ;;  %v2087_v50 = vmax.f32 %v2086_v0, 1e-09  ;;  %v2066_v20 = vpop.permute.xlu1 %2065 }
0x109b   :  { %v2031_v61 = vmax.f32 %v2029_v58, 0.0 }
0x109c   :  { %v2036_v62 = vadd.f32 1e-12, %v2032_v60 }
0x109d   :  { %v2035_v2 = vadd.f32 1e-12, %v2031_v61  ;;  %v2059_v14 = vpop.permute.xlu0 %2058 }
0x109e   :  { %2787 = vrsqrt.f32 %v2036_v62 }
0x109f   :  { %2789 = vrsqrt.f32 %v2035_v2 }
0x10a0   :  { %2791 = vrcp.f32 %v2087_v50 }
0x10a8   :  { %v2788_v37 = vpop.eup %2787 }
0x10a9   :  { %v2790_v3 = vpop.eup %2789  ;;  %v2040_v5 = vmul.f32 %v2788_v37, %v2034_v49 }
0x10aa   :  { %v2039_v12 = vmul.f32 %v2790_v3, %v2033_v1  ;;  %v2792_v17 = vpop.eup %2791 }
0x10ab   :  { %v2046_v10 = vmul.f32 %v2044_v31, %v2040_v5  ;;  %v2090_v28 = vrot.slane %v2792_v17, 1 }
0x10ac   :  { %v2045_v6 = vmul.f32 %v2044_v31, %v2039_v12 }
0x10ad   :  { %v2052_v4 = vadd.f32 %v2050_v7, %v2046_v10 }
0x10ae   :  { %v2051_v13 = vadd.f32 %v2050_v7, %v2045_v6 }
0x10af   :  { %v2068_v45 = vmul.f32 %v2066_v20, %v2052_v4 }
0x10b0   :  { %v2067_v43 = vmul.f32 %v2059_v14, %v2051_v13 }
0x10b1   :  { %v2076_v44 = vsel %vm86_vm0, %v2068_v45, 0.0 }
0x10b2   :  { %v2077_v19 = vrot.slane %v2076_v44, 4  ;;  %v2069_v15 = vsel %vm86_vm0, %v2067_v43, 0.0 }
0x10b3   :  { %v2070_v16 = vrot.slane %v2069_v15, 4 }
0x10b4   :  { %v2078_v47 = vadd.f32 %v2077_v19, %v2076_v44 }
0x10b5   :  { %v2071_v23 = vadd.f32 %v2070_v16, %v2069_v15 }
0x10b6   :  { %v2079_v57 = vrot.slane %v2078_v47, 2 }
0x10b7   :  { %v2072_v9 = vrot.slane %v2071_v23, 2 }
0x10b8   :  { %v2080_v21 = vadd.f32 %v2079_v57, %v2078_v47 }
0x10b9   :  { %v2073_v24 = vadd.f32 %v2072_v9, %v2071_v23 }
0x10ba   :  { %v2081_v25 = vrot.slane %v2080_v21, 1 }
0x10bb   :  { %v2074_v26 = vrot.slane %v2073_v24, 1 }
0x10bc   :  { %v2082_v52 = vadd.f32 %v2081_v25, %v2080_v21 }
0x10bd   :  { %v2075_v55 = vadd.f32 %v2074_v26, %v2073_v24 }
0x10be   :  { %v2094_v48 = vmul.f32 %v2090_v28, %v2082_v52 }
0x10bf   :  { %v2093_v29 = vmul.f32 %v2792_v17, %v2075_v55 }
0x10c0   :  { %v2097_v30 = vrot.slane %v2094_v48, 7 }
0x10c2   :  { %v2099_v56 = vsel %vm2098_vm5, %v2097_v30, %v2093_v29 }
0x10c3   :  { %2102 = vst.msk [vmem:[#allocation2] sm:$0x3] %vm2101_vm6, %v2099_v56 }
0x10c4   :  { %2804 = shalt.err (!%p2801_p4)
}
0x10c5   :  { %s2805_s14 = scalar_lea.hbm %s3415_s11, 32 }
0x10c6   :  { %p2806_p5 = scmp.ne.s32.totalorder %s3415_s11, %s2805_s14  ;;  %p2809_p6 = scmp.lt.u32.totalorder %s2805_s14, %s3415_s11 }
0x10c8   :  { %p2811_p7 = pnand %p2809_p6, %p2806_p5 }
0x10ca   :  { %2814 = shalt.err (!%p2811_p7)
}
0x10cb   :  { %2112 = dma.vmem_to_hbm [thread:$0]  %s2110_s12, 32, %s3415_s11, [#allocation3]  }
0x10cc   :  { %2815 = dma.done.wait [#allocation3], 32  }
0x10cd   :  { %2816 = vsyncadd [#allocation3], 4294967264 }
0x10ce   :  { %2116 = vsyncpa [#allocation3], 1 }

</bundles_post_ra>
